<compile_context>
chip_gen: v7x
topology: tpu7x:2x2x1
jax: 0.10.0
libtpu: 0.0.40
codegen_flags: <defaults>
</compile_context>

<pallas_src>
import jax
import jax.numpy as jnp
import numpy as np
from jax.experimental import pallas as pl
from jax.experimental.pallas import tpu as pltpu

# Logical (PyTorch) feature sizes.
DIMS = [961, 200, 50, 16, 8, 4]
# Hidden dims lane-padded (exact through matmul+bias+ReLU because padded
# weight rows/cols and biases are zero).  The K=961 contraction of layer 1 is
# left unpadded and handled by Mosaic.
PAD_DIMS = [961, 256, 128, 16, 8, 4]


def _round_up(x, m):
    return (x + m - 1) // m * m


def encoder_kernel(x_ref,
                   w1_ref, b1_ref,
                   w2_ref, b2_ref,
                   w3_ref, b3_ref,
                   w4_ref, b4_ref,
                   w5_ref, b5_ref,
                   o_ref):
    # Fully fused MLP: each layer is an MXU matmul (bf16 operands, f32
    # accumulation) + VPU bias add / ReLU.  Cast x to bf16 in-kernel (VPU),
    # avoiding any wrapper-side HBM round trip.
    x = x_ref[...].astype(w1_ref.dtype)                       # (tb, 961) bf16

    h = jnp.dot(x, w1_ref[...], preferred_element_type=jnp.float32) + b1_ref[...]
    h = jnp.maximum(h, 0.0)
    # TODO(synk): dropout1 (p=0.1) is identity in eval mode; no RNG applied.

    h = jnp.dot(h.astype(w2_ref.dtype), w2_ref[...],
                preferred_element_type=jnp.float32) + b2_ref[...]
    h = jnp.maximum(h, 0.0)
    # TODO(synk): dropout2 (p=0.1) is identity in eval mode; no RNG applied.

    h = jnp.dot(h.astype(w3_ref.dtype), w3_ref[...],
                preferred_element_type=jnp.float32) + b3_ref[...]
    h = jnp.maximum(h, 0.0)

    h = jnp.dot(h.astype(w4_ref.dtype), w4_ref[...],
                preferred_element_type=jnp.float32) + b4_ref[...]
    h = jnp.maximum(h, 0.0)

    logits = jnp.dot(h.astype(w5_ref.dtype), w5_ref[...],
                     preferred_element_type=jnp.float32) + b5_ref[...]

    # softmax over dim=1 (feature axis); exact normalization.
    m = jnp.max(logits, axis=-1, keepdims=True)
    e = jnp.exp(logits - m)
    y = e / jnp.sum(e, axis=-1, keepdims=True)
    o_ref[...] = y.astype(o_ref.dtype)


def encoder_forward(x, params, *, tb=1024):
    """x: (B, 961) float32; params: list of (W, b) with W=(in, out)."""
    B, F = x.shape
    assert F == DIMS[0]

    # ---- pad + cast weights once, wrapper-side (tiny, one-time) ------------
    flat_params = []
    for i, (w, b) in enumerate(params):
        din, dout = PAD_DIMS[i], PAD_DIMS[i + 1]
        wp = jnp.zeros((din, dout), jnp.float32)
        wp = wp.at[:w.shape[0], :w.shape[1]].set(w.astype(jnp.float32))
        wp = wp.astype(jnp.bfloat16)                 # bf16 MXU operands, f32 acc
        b2d = jnp.reshape(b, (1, -1)).astype(jnp.float32)
        bp = jnp.zeros((1, dout), jnp.float32).at[:, :b2d.shape[1]].set(b2d)
        flat_params += [wp, bp]

    # ---- batch tiling -------------------------------------------------------
    tb = max(8, min(int(tb), 2048))
    tb = _round_up(tb, 8)
    # Ensure >= 2 grid steps when the batch allows it so both v7x TensorCores
    # get work from the single "parallel" grid axis (no-op on 1-TC chips).
    tb = min(tb, max(8, _round_up(-(-B // 2), 8)))
    grid = (pl.cdiv(B, tb),)                         # ragged last block is OK

    x_spec = pl.BlockSpec((tb, F), lambda i: (i, 0))
    out_spec = pl.BlockSpec((tb, DIMS[-1]), lambda i: (i, 0))

    # Advisory cost estimate for XLA's scheduler.
    matmul_flops = 2 * B * sum(PAD_DIMS[i] * PAD_DIMS[i + 1] for i in range(5))
    bytes_in = x.size * x.dtype.itemsize
    bytes_in += sum(int(p.size) * p.dtype.itemsize for p in flat_params)
    bytes_out = B * DIMS[-1] * 4
    cost = pl.CostEstimate(flops=matmul_flops,
                           transcendentals=B * DIMS[-1],
                           bytes_accessed=bytes_in + bytes_out)

    def build(single_buffer_weights):
        if single_buffer_weights:
            # Weights/biases: full blocks, constant index_map -> resident in
            # VMEM across all batch tiles; single-buffer them to save VMEM.
            w_specs = [pl.BlockSpec(p.shape, lambda i: (0, 0),
                                    pipeline_mode=pl.Buffered(1))
                       for p in flat_params]
        else:
            w_specs = [pl.BlockSpec(p.shape, lambda i: (0, 0))
                       for p in flat_params]
        return pl.pallas_call(
            encoder_kernel,
            out_shape=jax.ShapeDtypeStruct((B, DIMS[-1]), jnp.float32),
            grid_spec=pltpu.PrefetchScalarGridSpec(
                num_scalar_prefetch=0,
                grid=grid,
                in_specs=[x_spec] + w_specs,
                out_specs=out_spec,
            ),
            compiler_params=pltpu.CompilerParams(
                dimension_semantics=("parallel",),
                vmem_limit_bytes=40 * 1024 * 1024,   # headroom for tb up to 2048
            ),
            cost_estimate=cost,
        )

    try:
        out = build(True)(x, *flat_params)
    except Exception:
        # Fallback: identical kernel without the single-buffer hint.
        out = build(False)(x, *flat_params)
    return out


def init_params(key):
    """Deterministic synthetic init (module shapes from __init__)."""
    params = []
    for i in range(len(DIMS) - 1):
        fan_in, fan_out = DIMS[i], DIMS[i + 1]
        key, kw, kb = jax.random.split(key, 3)
        bound = 1.0 / np.sqrt(fan_in)
        w = jax.random.uniform(kw, (fan_in, fan_out), jnp.float32, -bound, bound)
        b = jax.random.uniform(kb, (1, fan_out), jnp.float32, -bound, bound)
        params.append((w, b))
    return params


def reference_forward(x, params):
    h = x
    for i, (w, b) in enumerate(params):
        h = h @ w + b
        if i < len(params) - 1:
            h = jnp.maximum(h, 0.0)
    return jax.nn.softmax(h, axis=1)


if __name__ == "__main__":
    key = jax.random.PRNGKey(0)
    key, kx = jax.random.split(key)

    B = 16  # small batch for the self-test
    x = jax.random.normal(kx, (B, DIMS[0]), dtype=jnp.float32)
    params = init_params(key)

    y = encoder_forward(x, params, tb=1024)
    y = jax.block_until_ready(y)

    y_ref = reference_forward(x, params)
    # bf16 MXU operands => loosened tolerance vs the f32 reference.
    np.testing.assert_allclose(np.asarray(y), np.asarray(y_ref),
                               rtol=2e-2, atol=2e-2)
    assert y.shape == (B, 4)
    # Exact softmax normalization (plain divide, no approx reciprocal).
    np.testing.assert_allclose(np.asarray(y).sum(axis=1), np.ones(B),
                               rtol=1e-3, atol=1e-3)
    print("KERNEL_OK")
</pallas_src>

<mosaic_0001>
module attributes {stable_mosaic.version = 11 : i64} {
  func.func @encoder_kernel(%arg0: i32, %arg1: memref<8x961xf32, #tpu.memory_space<vmem>>, %arg2: memref<961x256xbf16, #tpu.memory_space<vmem>>, %arg3: memref<1x256xf32, #tpu.memory_space<vmem>>, %arg4: memref<256x128xbf16, #tpu.memory_space<vmem>>, %arg5: memref<1x128xf32, #tpu.memory_space<vmem>>, %arg6: memref<128x16xbf16, #tpu.memory_space<vmem>>, %arg7: memref<1x16xf32, #tpu.memory_space<vmem>>, %arg8: memref<16x8xbf16, #tpu.memory_space<vmem>>, %arg9: memref<1x8xf32, #tpu.memory_space<vmem>>, %arg10: memref<8x4xbf16, #tpu.memory_space<vmem>>, %arg11: memref<1x4xf32, #tpu.memory_space<vmem>>, %arg12: memref<8x4xf32, #tpu.memory_space<vmem>>) attributes {dimension_semantics = [#tpu.dimension_semantics<parallel>], iteration_bounds = array<i64: 2>, scalar_prefetch = 0 : i64, scratch_operands = 0 : i64, tpu.core_type = #tpu.core_type<tc>, window_params = [{transform_indices = @transform_0, window_bounds = array<i64: 8, 961>}, {pipeline_mode = #tpu.pipeline_mode<synchronous>, transform_indices = @transform_1, window_bounds = array<i64: 961, 256>}, {pipeline_mode = #tpu.pipeline_mode<synchronous>, transform_indices = @transform_2, window_bounds = array<i64: 1, 256>}, {pipeline_mode = #tpu.pipeline_mode<synchronous>, transform_indices = @transform_3, window_bounds = array<i64: 256, 128>}, {pipeline_mode = #tpu.pipeline_mode<synchronous>, transform_indices = @transform_4, window_bounds = array<i64: 1, 128>}, {pipeline_mode = #tpu.pipeline_mode<synchronous>, transform_indices = @transform_5, window_bounds = array<i64: 128, 16>}, {pipeline_mode = #tpu.pipeline_mode<synchronous>, transform_indices = @transform_6, window_bounds = array<i64: 1, 16>}, {pipeline_mode = #tpu.pipeline_mode<synchronous>, transform_indices = @transform_7, window_bounds = array<i64: 16, 8>}, {pipeline_mode = #tpu.pipeline_mode<synchronous>, transform_indices = @transform_8, window_bounds = array<i64: 1, 8>}, {pipeline_mode = #tpu.pipeline_mode<synchronous>, transform_indices = @transform_9, window_bounds = array<i64: 8, 4>}, {pipeline_mode = #tpu.pipeline_mode<synchronous>, transform_indices = @transform_10, window_bounds = array<i64: 1, 4>}, {transform_indices = @transform_11, window_bounds = array<i64: 8, 4>}]} {
    %c0 = arith.constant 0 : index
    %c0_0 = arith.constant 0 : index
    %0 = vector.load %arg1[%c0, %c0_0] : memref<8x961xf32, #tpu.memory_space<vmem>>, vector<8x961xf32>
    %1 = arith.truncf %0 : vector<8x961xf32> to vector<8x961xbf16>
    %c0_1 = arith.constant 0 : index
    %c0_2 = arith.constant 0 : index
    %2 = vector.load %arg2[%c0_1, %c0_2] : memref<961x256xbf16, #tpu.memory_space<vmem>>, vector<961x256xbf16>
    %cst = arith.constant dense<0.000000e+00> : vector<8x256xf32>
    %3 = tpu.matmul %1, %2, %cst {dimension_numbers = #tpu.dot_dimension_numbers<[1], [0], [0], [1], [0, 0, 1, 1], [], []>} : vector<8x961xbf16>, vector<961x256xbf16>, vector<8x256xf32> -> vector<8x256xf32>
    %c0_3 = arith.constant 0 : index
    %c0_4 = arith.constant 0 : index
    %4 = vector.load %arg3[%c0_3, %c0_4] : memref<1x256xf32, #tpu.memory_space<vmem>>, vector<1x256xf32>
    %5 = vector.broadcast %4 : vector<1x256xf32> to vector<8x256xf32>
    %6 = arith.addf %3, %5 : vector<8x256xf32>
    %cst_5 = arith.constant 0.000000e+00 : f32
    %7 = vector.broadcast %cst_5 : f32 to vector<8x256xf32>
    %8 = arith.maximumf %6, %7 : vector<8x256xf32>
    %9 = arith.truncf %8 : vector<8x256xf32> to vector<8x256xbf16>
    %c0_6 = arith.constant 0 : index
    %c0_7 = arith.constant 0 : index
    %10 = vector.load %arg4[%c0_6, %c0_7] : memref<256x128xbf16, #tpu.memory_space<vmem>>, vector<256x128xbf16>
    %cst_8 = arith.constant dense<0.000000e+00> : vector<8x128xf32>
    %11 = tpu.matmul %9, %10, %cst_8 {dimension_numbers = #tpu.dot_dimension_numbers<[1], [0], [0], [1], [0, 0, 1, 1], [], []>} : vector<8x256xbf16>, vector<256x128xbf16>, vector<8x128xf32> -> vector<8x128xf32>
    %c0_9 = arith.constant 0 : index
    %c0_10 = arith.constant 0 : index
    %12 = vector.load %arg5[%c0_9, %c0_10] : memref<1x128xf32, #tpu.memory_space<vmem>>, vector<1x128xf32>
    %13 = vector.broadcast %12 : vector<1x128xf32> to vector<8x128xf32>
    %14 = arith.addf %11, %13 : vector<8x128xf32>
    %cst_11 = arith.constant 0.000000e+00 : f32
    %15 = vector.broadcast %cst_11 : f32 to vector<8x128xf32>
    %16 = arith.maximumf %14, %15 : vector<8x128xf32>
    %17 = arith.truncf %16 : vector<8x128xf32> to vector<8x128xbf16>
    %c0_12 = arith.constant 0 : index
    %c0_13 = arith.constant 0 : index
    %18 = vector.load %arg6[%c0_12, %c0_13] : memref<128x16xbf16, #tpu.memory_space<vmem>>, vector<128x16xbf16>
    %cst_14 = arith.constant dense<0.000000e+00> : vector<8x16xf32>
    %19 = tpu.matmul %17, %18, %cst_14 {dimension_numbers = #tpu.dot_dimension_numbers<[1], [0], [0], [1], [0, 0, 1, 1], [], []>} : vector<8x128xbf16>, vector<128x16xbf16>, vector<8x16xf32> -> vector<8x16xf32>
    %c0_15 = arith.constant 0 : index
    %c0_16 = arith.constant 0 : index
    %20 = vector.load %arg7[%c0_15, %c0_16] : memref<1x16xf32, #tpu.memory_space<vmem>>, vector<1x16xf32>
    %21 = vector.broadcast %20 : vector<1x16xf32> to vector<8x16xf32>
    %22 = arith.addf %19, %21 : vector<8x16xf32>
    %cst_17 = arith.constant 0.000000e+00 : f32
    %23 = vector.broadcast %cst_17 : f32 to vector<8x16xf32>
    %24 = arith.maximumf %22, %23 : vector<8x16xf32>
    %25 = arith.truncf %24 : vector<8x16xf32> to vector<8x16xbf16>
    %c0_18 = arith.constant 0 : index
    %c0_19 = arith.constant 0 : index
    %26 = vector.load %arg8[%c0_18, %c0_19] : memref<16x8xbf16, #tpu.memory_space<vmem>>, vector<16x8xbf16>
    %cst_20 = arith.constant dense<0.000000e+00> : vector<8x8xf32>
    %27 = tpu.matmul %25, %26, %cst_20 {dimension_numbers = #tpu.dot_dimension_numbers<[1], [0], [0], [1], [0, 0, 1, 1], [], []>} : vector<8x16xbf16>, vector<16x8xbf16>, vector<8x8xf32> -> vector<8x8xf32>
    %c0_21 = arith.constant 0 : index
    %c0_22 = arith.constant 0 : index
    %28 = vector.load %arg9[%c0_21, %c0_22] : memref<1x8xf32, #tpu.memory_space<vmem>>, vector<1x8xf32>
    %29 = vector.broadcast %28 : vector<1x8xf32> to vector<8x8xf32>
    %30 = arith.addf %27, %29 : vector<8x8xf32>
    %cst_23 = arith.constant 0.000000e+00 : f32
    %31 = vector.broadcast %cst_23 : f32 to vector<8x8xf32>
    %32 = arith.maximumf %30, %31 : vector<8x8xf32>
    %33 = arith.truncf %32 : vector<8x8xf32> to vector<8x8xbf16>
    %c0_24 = arith.constant 0 : index
    %c0_25 = arith.constant 0 : index
    %34 = vector.load %arg10[%c0_24, %c0_25] : memref<8x4xbf16, #tpu.memory_space<vmem>>, vector<8x4xbf16>
    %cst_26 = arith.constant dense<0.000000e+00> : vector<8x4xf32>
    %35 = tpu.matmul %33, %34, %cst_26 {dimension_numbers = #tpu.dot_dimension_numbers<[1], [0], [0], [1], [0, 0, 1, 1], [], []>} : vector<8x8xbf16>, vector<8x4xbf16>, vector<8x4xf32> -> vector<8x4xf32>
    %c0_27 = arith.constant 0 : index
    %c0_28 = arith.constant 0 : index
    %36 = vector.load %arg11[%c0_27, %c0_28] : memref<1x4xf32, #tpu.memory_space<vmem>>, vector<1x4xf32>
    %37 = vector.broadcast %36 : vector<1x4xf32> to vector<8x4xf32>
    %38 = arith.addf %35, %37 : vector<8x4xf32>
    %cst_29 = arith.constant dense<0xFF800000> : vector<8xf32>
    %39 = vector.multi_reduction <maximumf>, %38, %cst_29 [1] : vector<8x4xf32> to vector<8xf32>
    %40 = vector.shape_cast %39 : vector<8xf32> to vector<8x1xf32>
    %41 = vector.broadcast %40 : vector<8x1xf32> to vector<8x4xf32>
    %42 = arith.subf %38, %41 : vector<8x4xf32>
    %43 = math.exp %42 : vector<8x4xf32>
    %cst_30 = arith.constant dense<0.000000e+00> : vector<8xf32>
    %44 = vector.multi_reduction <add>, %43, %cst_30 [1] : vector<8x4xf32> to vector<8xf32>
    %45 = vector.shape_cast %44 : vector<8xf32> to vector<8x1xf32>
    %46 = vector.broadcast %45 : vector<8x1xf32> to vector<8x4xf32>
    %47 = arith.divf %43, %46 : vector<8x4xf32>
    %c0_31 = arith.constant 0 : index
    %c0_32 = arith.constant 0 : index
    %48 = vector.load %arg12[%c0_31, %c0_32] : memref<8x4xf32, #tpu.memory_space<vmem>>, vector<8x4xf32>
    tpu.vector_store %arg12[%c0_31, %c0_32], %47 {strides = array<i32>} : memref<8x4xf32, #tpu.memory_space<vmem>>, vector<8x4xf32>,
    return
  }
  func.func @transform_0(%arg0: i32) -> (i32, i32) {
    %c0_i32 = arith.constant 0 : i32
    %c0_i32_0 = arith.constant 0 : i32
    return %arg0, %c0_i32 : i32, i32
  }
  func.func @transform_1(%arg0: i32) -> (i32, i32) {
    %c0_i32 = arith.constant 0 : i32
    %c0_i32_0 = arith.constant 0 : i32
    %c0_i32_1 = arith.constant 0 : i32
    return %c0_i32, %c0_i32_0 : i32, i32
  }
  func.func @transform_2(%arg0: i32) -> (i32, i32) {
    %c0_i32 = arith.constant 0 : i32
    %c0_i32_0 = arith.constant 0 : i32
    %c0_i32_1 = arith.constant 0 : i32
    return %c0_i32, %c0_i32_0 : i32, i32
  }
  func.func @transform_3(%arg0: i32) -> (i32, i32) {
    %c0_i32 = arith.constant 0 : i32
    %c0_i32_0 = arith.constant 0 : i32
    %c0_i32_1 = arith.constant 0 : i32
    return %c0_i32, %c0_i32_0 : i32, i32
  }
  func.func @transform_4(%arg0: i32) -> (i32, i32) {
    %c0_i32 = arith.constant 0 : i32
    %c0_i32_0 = arith.constant 0 : i32
    %c0_i32_1 = arith.constant 0 : i32
    return %c0_i32, %c0_i32_0 : i32, i32
  }
  func.func @transform_5(%arg0: i32) -> (i32, i32) {
    %c0_i32 = arith.constant 0 : i32
    %c0_i32_0 = arith.constant 0 : i32
    %c0_i32_1 = arith.constant 0 : i32
    return %c0_i32, %c0_i32_0 : i32, i32
  }
  func.func @transform_6(%arg0: i32) -> (i32, i32) {
    %c0_i32 = arith.constant 0 : i32
    %c0_i32_0 = arith.constant 0 : i32
    %c0_i32_1 = arith.constant 0 : i32
    return %c0_i32, %c0_i32_0 : i32, i32
  }
  func.func @transform_7(%arg0: i32) -> (i32, i32) {
    %c0_i32 = arith.constant 0 : i32
    %c0_i32_0 = arith.constant 0 : i32
    %c0_i32_1 = arith.constant 0 : i32
    return %c0_i32, %c0_i32_0 : i32, i32
  }
  func.func @transform_8(%arg0: i32) -> (i32, i32) {
    %c0_i32 = arith.constant 0 : i32
    %c0_i32_0 = arith.constant 0 : i32
    %c0_i32_1 = arith.constant 0 : i32
    return %c0_i32, %c0_i32_0 : i32, i32
  }
  func.func @transform_9(%arg0: i32) -> (i32, i32) {
    %c0_i32 = arith.constant 0 : i32
    %c0_i32_0 = arith.constant 0 : i32
    %c0_i32_1 = arith.constant 0 : i32
    return %c0_i32, %c0_i32_0 : i32, i32
  }
  func.func @transform_10(%arg0: i32) -> (i32, i32) {
    %c0_i32 = arith.constant 0 : i32
    %c0_i32_0 = arith.constant 0 : i32
    %c0_i32_1 = arith.constant 0 : i32
    return %c0_i32, %c0_i32_0 : i32, i32
  }
  func.func @transform_11(%arg0: i32) -> (i32, i32) {
    %c0_i32 = arith.constant 0 : i32
    %c0_i32_0 = arith.constant 0 : i32
    return %arg0, %c0_i32 : i32, i32
  }
}

module attributes {stable_mosaic.version = 11 : i64} {
  func.func @encoder_kernel(%arg0: i32, %arg1: memref<8x961xf32, #tpu.memory_space<vmem>>, %arg2: memref<961x256xbf16, #tpu.memory_space<vmem>>, %arg3: memref<1x256xf32, #tpu.memory_space<vmem>>, %arg4: memref<256x128xbf16, #tpu.memory_space<vmem>>, %arg5: memref<1x128xf32, #tpu.memory_space<vmem>>, %arg6: memref<128x16xbf16, #tpu.memory_space<vmem>>, %arg7: memref<1x16xf32, #tpu.memory_space<vmem>>, %arg8: memref<16x8xbf16, #tpu.memory_space<vmem>>, %arg9: memref<1x8xf32, #tpu.memory_space<vmem>>, %arg10: memref<8x4xbf16, #tpu.memory_space<vmem>>, %arg11: memref<1x4xf32, #tpu.memory_space<vmem>>, %arg12: memref<8x4xf32, #tpu.memory_space<vmem>>) attributes {dimension_semantics = [#tpu.dimension_semantics<parallel>], iteration_bounds = array<i64: 2>, scalar_prefetch = 0 : i64, scratch_operands = 0 : i64, tpu.core_type = #tpu.core_type<tc>, window_params = [{transform_indices = @transform_0, window_bounds = array<i64: 8, 961>}, {pipeline_mode = #tpu.pipeline_mode<synchronous>, transform_indices = @transform_1, window_bounds = array<i64: 961, 256>}, {pipeline_mode = #tpu.pipeline_mode<synchronous>, transform_indices = @transform_2, window_bounds = array<i64: 1, 256>}, {pipeline_mode = #tpu.pipeline_mode<synchronous>, transform_indices = @transform_3, window_bounds = array<i64: 256, 128>}, {pipeline_mode = #tpu.pipeline_mode<synchronous>, transform_indices = @transform_4, window_bounds = array<i64: 1, 128>}, {pipeline_mode = #tpu.pipeline_mode<synchronous>, transform_indices = @transform_5, window_bounds = array<i64: 128, 16>}, {pipeline_mode = #tpu.pipeline_mode<synchronous>, transform_indices = @transform_6, window_bounds = array<i64: 1, 16>}, {pipeline_mode = #tpu.pipeline_mode<synchronous>, transform_indices = @transform_7, window_bounds = array<i64: 16, 8>}, {pipeline_mode = #tpu.pipeline_mode<synchronous>, transform_indices = @transform_8, window_bounds = array<i64: 1, 8>}, {pipeline_mode = #tpu.pipeline_mode<synchronous>, transform_indices = @transform_9, window_bounds = array<i64: 8, 4>}, {pipeline_mode = #tpu.pipeline_mode<synchronous>, transform_indices = @transform_10, window_bounds = array<i64: 1, 4>}, {transform_indices = @transform_11, window_bounds = array<i64: 8, 4>}]} {
    %c0 = arith.constant 0 : index
    %c0_0 = arith.constant 0 : index
    %0 = vector.load %arg1[%c0, %c0_0] : memref<8x961xf32, #tpu.memory_space<vmem>>, vector<8x961xf32>
    %1 = arith.truncf %0 : vector<8x961xf32> to vector<8x961xbf16>
    %c0_1 = arith.constant 0 : index
    %c0_2 = arith.constant 0 : index
    %2 = vector.load %arg2[%c0_1, %c0_2] : memref<961x256xbf16, #tpu.memory_space<vmem>>, vector<961x256xbf16>
    %cst = arith.constant dense<0.000000e+00> : vector<8x256xf32>
    %3 = tpu.matmul %1, %2, %cst {dimension_numbers = #tpu.dot_dimension_numbers<[1], [0], [0], [1], [0, 0, 1, 1], [], []>} : vector<8x961xbf16>, vector<961x256xbf16>, vector<8x256xf32> -> vector<8x256xf32>
    %c0_3 = arith.constant 0 : index
    %c0_4 = arith.constant 0 : index
    %4 = vector.load %arg3[%c0_3, %c0_4] : memref<1x256xf32, #tpu.memory_space<vmem>>, vector<1x256xf32>
    %5 = vector.broadcast %4 : vector<1x256xf32> to vector<8x256xf32>
    %6 = arith.addf %3, %5 : vector<8x256xf32>
    %cst_5 = arith.constant 0.000000e+00 : f32
    %7 = vector.broadcast %cst_5 : f32 to vector<8x256xf32>
    %8 = arith.maximumf %6, %7 : vector<8x256xf32>
    %9 = arith.truncf %8 : vector<8x256xf32> to vector<8x256xbf16>
    %c0_6 = arith.constant 0 : index
    %c0_7 = arith.constant 0 : index
    %10 = vector.load %arg4[%c0_6, %c0_7] : memref<256x128xbf16, #tpu.memory_space<vmem>>, vector<256x128xbf16>
    %cst_8 = arith.constant dense<0.000000e+00> : vector<8x128xf32>
    %11 = tpu.matmul %9, %10, %cst_8 {dimension_numbers = #tpu.dot_dimension_numbers<[1], [0], [0], [1], [0, 0, 1, 1], [], []>} : vector<8x256xbf16>, vector<256x128xbf16>, vector<8x128xf32> -> vector<8x128xf32>
    %c0_9 = arith.constant 0 : index
    %c0_10 = arith.constant 0 : index
    %12 = vector.load %arg5[%c0_9, %c0_10] : memref<1x128xf32, #tpu.memory_space<vmem>>, vector<1x128xf32>
    %13 = vector.broadcast %12 : vector<1x128xf32> to vector<8x128xf32>
    %14 = arith.addf %11, %13 : vector<8x128xf32>
    %cst_11 = arith.constant 0.000000e+00 : f32
    %15 = vector.broadcast %cst_11 : f32 to vector<8x128xf32>
    %16 = arith.maximumf %14, %15 : vector<8x128xf32>
    %17 = arith.truncf %16 : vector<8x128xf32> to vector<8x128xbf16>
    %c0_12 = arith.constant 0 : index
    %c0_13 = arith.constant 0 : index
    %18 = vector.load %arg6[%c0_12, %c0_13] : memref<128x16xbf16, #tpu.memory_space<vmem>>, vector<128x16xbf16>
    %cst_14 = arith.constant dense<0.000000e+00> : vector<8x16xf32>
    %19 = tpu.matmul %17, %18, %cst_14 {dimension_numbers = #tpu.dot_dimension_numbers<[1], [0], [0], [1], [0, 0, 1, 1], [], []>} : vector<8x128xbf16>, vector<128x16xbf16>, vector<8x16xf32> -> vector<8x16xf32>
    %c0_15 = arith.constant 0 : index
    %c0_16 = arith.constant 0 : index
    %20 = vector.load %arg7[%c0_15, %c0_16] : memref<1x16xf32, #tpu.memory_space<vmem>>, vector<1x16xf32>
    %21 = vector.broadcast %20 : vector<1x16xf32> to vector<8x16xf32>
    %22 = arith.addf %19, %21 : vector<8x16xf32>
    %cst_17 = arith.constant 0.000000e+00 : f32
    %23 = vector.broadcast %cst_17 : f32 to vector<8x16xf32>
    %24 = arith.maximumf %22, %23 : vector<8x16xf32>
    %25 = arith.truncf %24 : vector<8x16xf32> to vector<8x16xbf16>
    %c0_18 = arith.constant 0 : index
    %c0_19 = arith.constant 0 : index
    %26 = vector.load %arg8[%c0_18, %c0_19] : memref<16x8xbf16, #tpu.memory_space<vmem>>, vector<16x8xbf16>
    %cst_20 = arith.constant dense<0.000000e+00> : vector<8x8xf32>
    %27 = tpu.matmul %25, %26, %cst_20 {dimension_numbers = #tpu.dot_dimension_numbers<[1], [0], [0], [1], [0, 0, 1, 1], [], []>} : vector<8x16xbf16>, vector<16x8xbf16>, vector<8x8xf32> -> vector<8x8xf32>
    %c0_21 = arith.constant 0 : index
    %c0_22 = arith.constant 0 : index
    %28 = vector.load %arg9[%c0_21, %c0_22] : memref<1x8xf32, #tpu.memory_space<vmem>>, vector<1x8xf32>
    %29 = vector.broadcast %28 : vector<1x8xf32> to vector<8x8xf32>
    %30 = arith.addf %27, %29 : vector<8x8xf32>
    %cst_23 = arith.constant 0.000000e+00 : f32
    %31 = vector.broadcast %cst_23 : f32 to vector<8x8xf32>
    %32 = arith.maximumf %30, %31 : vector<8x8xf32>
    %33 = arith.truncf %32 : vector<8x8xf32> to vector<8x8xbf16>
    %c0_24 = arith.constant 0 : index
    %c0_25 = arith.constant 0 : index
    %34 = vector.load %arg10[%c0_24, %c0_25] : memref<8x4xbf16, #tpu.memory_space<vmem>>, vector<8x4xbf16>
    %cst_26 = arith.constant dense<0.000000e+00> : vector<8x4xf32>
    %35 = tpu.matmul %33, %34, %cst_26 {dimension_numbers = #tpu.dot_dimension_numbers<[1], [0], [0], [1], [0, 0, 1, 1], [], []>} : vector<8x8xbf16>, vector<8x4xbf16>, vector<8x4xf32> -> vector<8x4xf32>
    %c0_27 = arith.constant 0 : index
    %c0_28 = arith.constant 0 : index
    %36 = vector.load %arg11[%c0_27, %c0_28] : memref<1x4xf32, #tpu.memory_space<vmem>>, vector<1x4xf32>
    %37 = vector.broadcast %36 : vector<1x4xf32> to vector<8x4xf32>
    %38 = arith.addf %35, %37 : vector<8x4xf32>
    %cst_29 = arith.constant dense<0xFF800000> : vector<8xf32>
    %39 = vector.multi_reduction <maximumf>, %38, %cst_29 [1] : vector<8x4xf32> to vector<8xf32>
    %40 = vector.shape_cast %39 : vector<8xf32> to vector<8x1xf32>
    %41 = vector.broadcast %40 : vector<8x1xf32> to vector<8x4xf32>
    %42 = arith.subf %38, %41 : vector<8x4xf32>
    %43 = math.exp %42 : vector<8x4xf32>
    %cst_30 = arith.constant dense<0.000000e+00> : vector<8xf32>
    %44 = vector.multi_reduction <add>, %43, %cst_30 [1] : vector<8x4xf32> to vector<8xf32>
    %45 = vector.shape_cast %44 : vector<8xf32> to vector<8x1xf32>
    %46 = vector.broadcast %45 : vector<8x1xf32> to vector<8x4xf32>
    %47 = arith.divf %43, %46 : vector<8x4xf32>
    %c0_31 = arith.constant 0 : index
    %c0_32 = arith.constant 0 : index
    %48 = vector.load %arg12[%c0_31, %c0_32] : memref<8x4xf32, #tpu.memory_space<vmem>>, vector<8x4xf32>
    tpu.vector_store %arg12[%c0_31, %c0_32], %47 {strides = array<i32>} : memref<8x4xf32, #tpu.memory_space<vmem>>, vector<8x4xf32>,
    return
  }
  func.func @transform_0(%arg0: i32) -> (i32, i32) {
    %c0_i32 = arith.constant 0 : i32
    %c0_i32_0 = arith.constant 0 : i32
    return %arg0, %c0_i32 : i32, i32
  }
  func.func @transform_1(%arg0: i32) -> (i32, i32) {
    %c0_i32 = arith.constant 0 : i32
    %c0_i32_0 = arith.constant 0 : i32
    %c0_i32_1 = arith.constant 0 : i32
    return %c0_i32, %c0_i32_0 : i32, i32
  }
  func.func @transform_2(%arg0: i32) -> (i32, i32) {
    %c0_i32 = arith.constant 0 : i32
    %c0_i32_0 = arith.constant 0 : i32
    %c0_i32_1 = arith.constant 0 : i32
    return %c0_i32, %c0_i32_0 : i32, i32
  }
  func.func @transform_3(%arg0: i32) -> (i32, i32) {
    %c0_i32 = arith.constant 0 : i32
    %c0_i32_0 = arith.constant 0 : i32
    %c0_i32_1 = arith.constant 0 : i32
    return %c0_i32, %c0_i32_0 : i32, i32
  }
  func.func @transform_4(%arg0: i32) -> (i32, i32) {
    %c0_i32 = arith.constant 0 : i32
    %c0_i32_0 = arith.constant 0 : i32
    %c0_i32_1 = arith.constant 0 : i32
    return %c0_i32, %c0_i32_0 : i32, i32
  }
  func.func @transform_5(%arg0: i32) -> (i32, i32) {
    %c0_i32 = arith.constant 0 : i32
    %c0_i32_0 = arith.constant 0 : i32
    %c0_i32_1 = arith.constant 0 : i32
    return %c0_i32, %c0_i32_0 : i32, i32
  }
  func.func @transform_6(%arg0: i32) -> (i32, i32) {
    %c0_i32 = arith.constant 0 : i32
    %c0_i32_0 = arith.constant 0 : i32
    %c0_i32_1 = arith.constant 0 : i32
    return %c0_i32, %c0_i32_0 : i32, i32
  }
  func.func @transform_7(%arg0: i32) -> (i32, i32) {
    %c0_i32 = arith.constant 0 : i32
    %c0_i32_0 = arith.constant 0 : i32
    %c0_i32_1 = arith.constant 0 : i32
    return %c0_i32, %c0_i32_0 : i32, i32
  }
  func.func @transform_8(%arg0: i32) -> (i32, i32) {
    %c0_i32 = arith.constant 0 : i32
    %c0_i32_0 = arith.constant 0 : i32
    %c0_i32_1 = arith.constant 0 : i32
    return %c0_i32, %c0_i32_0 : i32, i32
  }
  func.func @transform_9(%arg0: i32) -> (i32, i32) {
    %c0_i32 = arith.constant 0 : i32
    %c0_i32_0 = arith.constant 0 : i32
    %c0_i32_1 = arith.constant 0 : i32
    return %c0_i32, %c0_i32_0 : i32, i32
  }
  func.func @transform_10(%arg0: i32) -> (i32, i32) {
    %c0_i32 = arith.constant 0 : i32
    %c0_i32_0 = arith.constant 0 : i32
    %c0_i32_1 = arith.constant 0 : i32
    return %c0_i32, %c0_i32_0 : i32, i32
  }
  func.func @transform_11(%arg0: i32) -> (i32, i32) {
    %c0_i32 = arith.constant 0 : i32
    %c0_i32_0 = arith.constant 0 : i32
    return %arg0, %c0_i32 : i32, i32
  }
}

</mosaic_0001>

<bundles_post_ra>
// kernel: tpu_custom_call.1
= control target key start
LH: loop header
LB: loop body
LE: loop exit
PB: predicated region body
PF: predicated region fallthrough
CT: control target
= control target key end

     0   :  { %s2841_s0 = inlined_call_operand.hbm [shape: f32[16,961], index: 0, kind: input, shape index: {}]   ;;  %s2842_s1 = inlined_call_operand.hbm [shape: bf16[961,256], index: 1, kind: input, shape index: {}]   ;;  %s2843_s2 = inlined_call_operand.vmem [shape: f32[1,256], index: 2, kind: input, shape index: {}]   ;;  %s2844_s3 = inlined_call_operand.hbm [shape: bf16[256,128], index: 3, kind: input, shape index: {}]   ;;  %s2845_s4 = inlined_call_operand.vmem [shape: f32[1,128], index: 4, kind: input, shape index: {}]   ;;  %s2846_s5 = inlined_call_operand.vmem [shape: bf16[128,16], index: 5, kind: input, shape index: {}]   ;;  %s2847_s6 = inlined_call_operand.vmem [shape: f32[1,16], index: 6, kind: input, shape index: {}]   ;;  %s2848_s7 = inlined_call_operand.vmem [shape: bf16[16,8], index: 7, kind: input, shape index: {}]   ;;  %s2849_s8 = inlined_call_operand.vmem [shape: f32[1,8], index: 8, kind: input, shape index: {}]   ;;  %s2850_s9 = inlined_call_operand.vmem [shape: bf16[8,4], index: 9, kind: input, shape index: {}]   ;;  %s2851_s10 = inlined_call_operand.vmem [shape: f32[1,4], index: 10, kind: input, shape index: {}]   ;;  %s2852_s11 = inlined_call_operand.vmem [shape: f32[16,4], index: 11, kind: output, shape index: {}]  }
   0x1   :  { %2856 = sst [smem:[#allocation9_spill]] %s2852_s11 }
   0x2   :  { %16 = vsyncpa [#allocation3], 0 }
   0x3   :  { %18 = vsyncpa [#allocation3 + $0x1], 0 }
   0x4   :  { %19 = vsyncpa [#allocation5], 0  ;;  %s2595_s17 = smov 0   ;;  %s2597_s18 = smov 0  }
   0x5   :  { %s2599_s19 = smov 0   ;;  %s2601_s20 = smov 0  }
   0x6 LB: > { %s2614_s21 = sadd.s32 4294967295, %s2523_s20   ;;  %p45_p0 = scmp.ne.s32.totalorder %s2515_s18, %s2511_s17  ;;  %s2523_s20 = sphi %s2601_s20, %s2869_s20   ;;  %s2519_s19 = sphi %s2599_s19, %s2868_s19   ;;  %s2515_s18 = sphi %s2597_s18, %s2867_s18   ;;  %s2511_s17 = sphi %s2595_s17, %s2866_s17  }
   0x7   : > { %p2853_p1 = scmp.eq.s32.totalorder %s2614_s21, 0  ;;  %p1873_p2 = scmp.ge.s32.totalorder %s2523_s20, 1 }
   0x8   : > { %p292_p3 = scmp.lt.s32.totalorder %s2523_s20, 3  ;;  %s2525_s24 = smov [#allocation4]  }
   0x9   : > { %p2622_p4 = por %p2853_p1, %p45_p0  ;;  %s304_s25 = sshll.u32 %s2525_s24, 4  ;;  %s305_s25 = int_to_ptr.vmem [resolvable:$true] %s304_s25 }
   0xa   : > { %p2626_p5 = pnand %p1873_p2, %p292_p3  ;;  %s2526_s27 = smov [#allocation6]  }
   0xb   : > { %s2857_s22 = scalar_select %p2622_p4, 1, 0 }
   0xc   : > { %s2858_s23 = scalar_select %p2626_p5, 1, 0 }
   0xd   : > { %p2131_p6 = pneg %p2626_p5  ;;  %s320_s28 = sshll.u32 %s2526_s27, 4  ;;  %s2638_s28 = int_to_ptr.vmem [resolvable:$true] %s320_s28 }
   0xe   : > { %s2399_s12 = scalar_lea.hbm %s2842_s1, 15488 }
   0xf   : > { %p2634_p7 = pnand %p2131_p6, %p2853_p1  ;;  %p2400_p8 = scmp.ne.s32.totalorder %s2842_s1, %s2399_s12 }
  0x10   : > { %p2406_p12 = scmp.lt.u32.totalorder %s2399_s12, %s2842_s1 }
  0x11   : > { %p2401_p9 = pneg %p2634_p7 }
  0x13   : > { %p2402_p10 = pnand %p2401_p9, %p2400_p8 }
  0x15   : > { %p2403_p11 = pneg %p2402_p10 }
  0x17   : > { %p2408_p13 = pnand %p2406_p12, %p2403_p11 }
  0x19   : > { %2411 = shalt.err (!%p2408_p13)
}
  0x1a   : > { %s2412_s17 = scalar_lea.vmem %s305_s25, 15488  ;;  %p2420_p6 = scmp.lt.s32.totalorder %s305_s25, %s305_s25 }
  0x1b   : > { %p2413_p0 = scmp.ne.s32.totalorder %s305_s25, %s2412_s17  ;;  %p2421_p1 = scmp.lt.s32.totalorder %s2412_s17, %s2412_s17 }
  0x1d   : > { %p2415_p2 = pnand %p2413_p0, %p2401_p9  ;;  %p2422_p4 = por %p2421_p1, %p2420_p6 }
  0x1f   : > { %p2416_p3 = pneg %p2415_p2 }
  0x21   : > { %p2423_p5 = pnand %p2422_p4, %p2416_p3 }
  0x23   : > { %2426 = shalt.err (!%p2423_p5)
}
  0x24   : > { %s2527_s24 = smov 128   ;;  %s2528_s27 = smov 8  }
  0x25   : > { %2134 = dma.hbm_to_vmem [thread:$0]  (!%p2634_p7), %s2842_s1, 15488, %s305_s25, [#allocation5], %s2527_s24, %s2527_s24, %s2528_s27  }
  0x26   : > { %s2427_s14 = scalar_lea.hbm %s2844_s3, 2048 }
  0x27   : > { %p2428_p8 = scmp.ne.s32.totalorder %s2844_s3, %s2427_s14  ;;  %p2434_p5 = scmp.lt.u32.totalorder %s2427_s14, %s2844_s3 }
  0x29   : > { %p2430_p1 = pnand %p2428_p8, %p2401_p9 }
  0x2b   : > { %p2431_p4 = pneg %p2430_p1 }
  0x2d   : > { %p2436_p10 = pnand %p2434_p5, %p2431_p4 }
  0x2f   : > { %2439 = shalt.err (!%p2436_p10)
}
  0x30   : > { %s2440_s25 = scalar_lea.vmem %s2638_s28, 2048  ;;  %p2448_p0 = scmp.lt.s32.totalorder %s2638_s28, %s2638_s28 }
  0x31   : > { %p2441_p11 = scmp.ne.s32.totalorder %s2638_s28, %s2440_s25  ;;  %p2449_p2 = scmp.lt.s32.totalorder %s2440_s25, %s2440_s25 }
  0x33   : > { %p2443_p12 = pnand %p2441_p11, %p2401_p9  ;;  %p2450_p3 = por %p2449_p2, %p2448_p0 }
  0x35   : > { %p2444_p13 = pneg %p2443_p12 }
  0x37   : > { %p2451_p6 = pnand %p2450_p3, %p2444_p13 }
  0x39   : > { %2454 = shalt.err (!%p2451_p6)
}
  0x3a   : > { %s2529_s11 = smov 64   ;;  %s2530_s24 = smov 4  }
  0x3b   : > { %2137 = dma.hbm_to_vmem [thread:$0]  (!%p2634_p7), %s2844_s3, 2048, %s2638_s28, [#allocation5], %s2529_s11, %s2529_s11, %s2530_s24  }
  0x3c   : > { %s2688_s30 = sadd.s32 1, %s2523_s20   ;;  %s32_s13 = sadd.s32 1, %s2519_s19 }
  0x3d   : > { %s29_s12 = ssub.s32 %s2523_s20, %s2688_s30  ;;  %p39_p8 = scmp.ne.s32.totalorder %s2519_s19, %s2515_s18 }
  0x3e   : > { %p30_p9 = scmp.eq.s32.totalorder %s29_s12, 0  ;;  %p40_p1 = scmp.eq.s32.totalorder %s2523_s20, 0 }
  0x3f   : > { %p2144_p5 = scmp.lt.s32.totalorder %s2523_s20, 2  ;;  %s355_s15 = sand.u32 1, %s2519_s19  }
  0x40   : > { %s2697_s14 = scalar_select %p30_p9, %s2519_s19, %s32_s13  }
  0x41   : > { %p41_p4 = por %p40_p1, %p39_p8  ;;  %s2041_s16 = sshll.u32 %s2523_s20, 10 }
  0x42   : > { %s1877_s17 = sshll.u32 %s355_s15, 6  ;;  %s2705_s27 = scalar_lea.hbm %s2841_s0, %s2041_s16 }
  0x43   : > { %s359_s28 = scalar_lea.vmem [#allocation2], %s1877_s17  ;;  %p2707_p7 = pnand %p2144_p5, %p41_p4 }
  0x44   : > { %s367_s11 = sshll.u32 %s359_s28, 4  ;;  %s356_s20 = scalar_lea.sflag [#allocation3], %s355_s15  ;;  %s2711_s11 = int_to_ptr.vmem [resolvable:$true] %s367_s11 }
  0x45   : > { %s2455_s29 = scalar_lea.hbm %s2705_s27, 1024  ;;  %p2457_p11 = pneg %p2707_p7 }
  0x46   : > { %p2456_p10 = scmp.ne.s32.totalorder %s2705_s27, %s2455_s29  ;;  %s2460_s16 = scalar_lea.hbm %s2841_s0, 2048 }
  0x47   : > { %p2461_p0 = scmp.lt.u32.totalorder %s2705_s27, %s2841_s0  ;;  %p2462_p2 = scmp.lt.u32.totalorder %s2460_s16, %s2455_s29 }
  0x48   : > { %p2458_p12 = pnand %p2457_p11, %p2456_p10  ;;  %p2464_p6 = scmp.lt.u32.totalorder %s2455_s29, %s2705_s27 }
  0x49   : > { %p2463_p3 = por %p2462_p2, %p2461_p0 }
  0x4a   : > { %p2459_p13 = pneg %p2458_p12 }
  0x4b   : > { %p2465_p9 = por %p2464_p6, %p2463_p3 }
  0x4d   : > { %p2466_p8 = pnand %p2465_p9, %p2459_p13 }
  0x4f   : > { %2469 = shalt.err (!%p2466_p8)
}
  0x50   : > { %s2470_s15 = scalar_lea.vmem %s2711_s11, 1024  ;;  %s2531_s25 = smov [#allocation2]  }
  0x51   : > { %p2471_p1 = scmp.ne.s32.totalorder %s2711_s11, %s2470_s15  ;;  %s2475_s28 = sshll.u32 %s2531_s25, 4  ;;  %s2476_s28 = int_to_ptr.vmem [resolvable:$false] %s2475_s28 }
  0x52   : > { %s2477_s12 = scalar_lea.vmem %s2476_s28, 2048  ;;  %p2478_p10 = scmp.lt.s32.totalorder %s2711_s11, %s2476_s28 }
  0x53   : > { %p2473_p4 = pnand %p2471_p1, %p2457_p11  ;;  %p2479_p12 = scmp.lt.s32.totalorder %s2477_s12, %s2470_s15 }
  0x55   : > { %p2474_p5 = pneg %p2473_p4  ;;  %p2480_p0 = por %p2479_p12, %p2478_p10 }
  0x57   : > { %p2481_p2 = pnand %p2480_p0, %p2474_p5 }
  0x59   : > { %2484 = shalt.err (!%p2481_p2)
}
  0x5a   : > { %2141 = dma.hbm_to_vmem [thread:$0]  (!%p2707_p7), %s2705_s27, 1024, %s2711_s11, %s356_s20  }
  0x5b   : > { %p2861_p13 = scmp.ne.s32.totalorder %s2858_s23, 0 }
  0x5c   : > { %s378_s29 = sand.u32 (!%p2861_p13), 1, %s2515_s18   ;;  %p2862_p11 = scmp.ne.s32.totalorder (!%p2861_p13), %s2857_s22, 0 }
  0x5d   : > { %376 = sbr.rel (%p2861_p13) target bundleno = 1691 (0x69b), region = 64  ;;  %s1881_s13 = sshll.u32 (!%p2861_p13), %s378_s29, 6 }
  0x5e   : > { %s379_s16 = scalar_lea.sflag (!%p2861_p13), [#allocation3], %s378_s29  ;;  %s2741_s17 = scalar_lea.vmem (!%p2861_p13), [#allocation2], %s1881_s13 }
  0x64   : > { %2502 = dma.done.wait (%p2862_p11), %s379_s16, 1024  }
  0x65   : > { %2504 = vsyncadd (%p2862_p11), %s379_s16, 4294966272  ;;  %p2863_p3 = scmp.eq.s32.totalorder %s2614_s21, 0 }
  0x67   : > { %2506 = dma.done.wait (%p2863_p3), [#allocation5], 17536   ;;  %p2864_p7 = pmov %p2863_p3 }
  0x68   : > { %v2188_v0 = vld [vmem:[#allocation4 + $0x104] ss:$8 sps:$4 sm:$0xff]   ;;  %v2190_v1 = vld [vmem:[#allocation4 + $0x100] ss:$8 sps:$4 sm:$0xff]   ;;  %v2191_v2 = vld [vmem:[#allocation4 + $0x114] ss:$8 sps:$4 sm:$0xff]  }
  0x69   : > { %2508 = vsyncadd (%p2864_p7), [#allocation5], 4294949760  ;;  %1241 = vmatprep.subr.bf16.mxu0 %v2188_v0  ;;  %v2193_v3 = vld [vmem:[#allocation4 + $0x110] ss:$8 sps:$4 sm:$0xff]   ;;  %v2194_v4 = vld [vmem:[#allocation4 + $0x124] ss:$8 sps:$4 sm:$0xff]  }
  0x6a   : > { %1242 = vmatpush1.bf16.msra.mxu0 %v2190_v1  ;;  %v2196_v5 = vld [vmem:[#allocation4 + $0x120] ss:$8 sps:$4 sm:$0xff]   ;;  %v2197_v6 = vld [vmem:[#allocation4 + $0x134] ss:$8 sps:$4 sm:$0xff]   ;;  %v2199_v7 = vld [vmem:[#allocation4 + $0x130] ss:$8 sps:$4 sm:$0xff]  }
  0x6b   : > { %1243 = vmatprep.subr.bf16.mxu0 %v2191_v2  ;;  %v2200_v8 = vld [vmem:[#allocation4 + $0x144] ss:$8 sps:$4 sm:$0xff]   ;;  %v2202_v9 = vld [vmem:[#allocation4 + $0x140] ss:$8 sps:$4 sm:$0xff]   ;;  %v2203_v10 = vld [vmem:[#allocation4 + $0x154] ss:$8 sps:$4 sm:$0xff]  }
  0x6c   : > { %v2205_v11 = vld [vmem:[#allocation4 + $0x150] ss:$8 sps:$4 sm:$0xff]   ;;  %v2206_v12 = vld [vmem:[#allocation4 + $0x164] ss:$8 sps:$4 sm:$0xff]   ;;  %v2208_v15 = vld [vmem:[#allocation4 + $0x160] ss:$8 sps:$4 sm:$0xff]  }
  0x6d   : > { %v436_v13 = vld [vmem:[%s2741_s17 + $0x18] sm:$0xff]  ;;  %v2212_v18 = vld [vmem:[#allocation4 + $0x184] ss:$8 sps:$4 sm:$0xff]   ;;  %v2214_v19 = vld [vmem:[#allocation4 + $0x180] ss:$8 sps:$4 sm:$0xff]   ;;  %vm1187_vm0 = vcmask 531456  }
  0x6e   : > { %1244 = vmatpush1.bf16.msra.mxu0 %v2193_v3  ;;  %v444_v14 = vpack.c.bf16 %v436_v13, %v436_v13  ;;  %v2209_v16 = vld [vmem:[#allocation4 + $0x174] ss:$8 sps:$4 sm:$0xff]   ;;  %v2211_v17 = vld [vmem:[#allocation4 + $0x170] ss:$8 sps:$4 sm:$0xff]   ;;  %v2218_v22 = vld [vmem:[#allocation4 + $0x1a4] ss:$8 sps:$4 sm:$0xff]  }
  0x6f   : > { %1245 = vmatprep.subr.bf16.mxu0 %v2194_v4  ;;  %v2215_v20 = vld [vmem:[#allocation4 + $0x194] ss:$8 sps:$4 sm:$0xff]   ;;  %v2217_v21 = vld [vmem:[#allocation4 + $0x190] ss:$8 sps:$4 sm:$0xff]   ;;  %v2220_v23 = vld [vmem:[#allocation4 + $0x1a0] ss:$8 sps:$4 sm:$0xff]  }
  0x70   : > { %1273 = vmatprep.mubr.bf16.mxu0 %v444_v14  ;;  %v2272_v24 = vld [vmem:[#allocation4 + $0x4] ss:$8 sps:$4 sm:$0xff]   ;;  %v2274_v25 = vld [vmem:[#allocation4] ss:$8 sps:$4 sm:$0xff]   ;;  %v2221_v26 = vld [vmem:[#allocation4 + $0x1b4] ss:$8 sps:$4 sm:$0xff]  }
  0x71   : > { %1200 = vmatprep.subr.bf16.mxu1 %v2272_v24  ;;  %v2278_v27 = vld [vmem:[#allocation4 + $0x14] ss:$8 sps:$4 sm:$0xff]   ;;  %v2280_v28 = vld [vmem:[#allocation4 + $0x10] ss:$8 sps:$4 sm:$0xff]   ;;  %v2224_v30 = vld [vmem:[#allocation4 + $0x1c4] ss:$8 sps:$4 sm:$0xff]  }
  0x72   : > { %1246 = vmatpush1.bf16.msra.mxu0 %v2196_v5  ;;  %1201 = vmatpush1.bf16.msra.mxu1 %v2274_v25  ;;  %v2223_v29 = vld [vmem:[#allocation4 + $0x1b0] ss:$8 sps:$4 sm:$0xff]   ;;  %v2284_v31 = vld [vmem:[#allocation4 + $0x24] ss:$8 sps:$4 sm:$0xff]   ;;  %v2286_v32 = vld [vmem:[#allocation4 + $0x20] ss:$8 sps:$4 sm:$0xff]  }
  0x73   : > { %1247 = vmatprep.subr.bf16.mxu0 %v2197_v6  ;;  %1202 = vmatprep.subr.bf16.mxu1 %v2278_v27  ;;  %v2290_v33 = vld [vmem:[#allocation4 + $0x34] ss:$8 sps:$4 sm:$0xff]   ;;  %v2226_v34 = vld [vmem:[#allocation4 + $0x1c0] ss:$8 sps:$4 sm:$0xff]   ;;  %v2292_v36 = vld [vmem:[#allocation4 + $0x30] ss:$8 sps:$4 sm:$0xff]  }
  0x74   : > { %v2227_v35 = vld [vmem:[#allocation4 + $0x1d4] ss:$8 sps:$4 sm:$0xff]   ;;  %v2296_v37 = vld [vmem:[#allocation4 + $0x44] ss:$8 sps:$4 sm:$0xff]   ;;  %v2229_v38 = vld [vmem:[#allocation4 + $0x1d0] ss:$8 sps:$4 sm:$0xff]  }
  0x75   : > { %v2230_v39 = vld [vmem:[#allocation4 + $0x1e4] ss:$8 sps:$4 sm:$0xff]   ;;  %v2298_v40 = vld [vmem:[#allocation4 + $0x40] ss:$8 sps:$4 sm:$0xff]   ;;  %v2302_v41 = vld [vmem:[#allocation4 + $0x54] ss:$8 sps:$4 sm:$0xff]  }
  0x76   : > { %1248 = vmatpush1.bf16.msra.mxu0 %v2199_v7  ;;  %1203 = vmatpush1.bf16.msra.mxu1 %v2280_v28  ;;  %v2232_v42 = vld [vmem:[#allocation4 + $0x1e0] ss:$8 sps:$4 sm:$0xff]   ;;  %v2233_v43 = vld [vmem:[#allocation4 + $0x1f4] ss:$8 sps:$4 sm:$0xff]   ;;  %v2304_v44 = vld [vmem:[#allocation4 + $0x50] ss:$8 sps:$4 sm:$0xff]  }
  0x77   : > { %1249 = vmatprep.subr.bf16.mxu0 %v2200_v8  ;;  %1204 = vmatprep.subr.bf16.mxu1 %v2284_v31  ;;  %v2235_v45 = vld [vmem:[#allocation4 + $0x1f0] ss:$8 sps:$4 sm:$0xff]   ;;  %v2308_v46 = vld [vmem:[#allocation4 + $0x64] ss:$8 sps:$4 sm:$0xff]   ;;  %v2310_v50 = vld [vmem:[#allocation4 + $0x60] ss:$8 sps:$4 sm:$0xff]  }
  0x78   : > { %v2238_v47 = vld [vmem:[#allocation4 + $0x204] ss:$8 sps:$4 sm:$0xff]   ;;  %v435_v48 = vld [vmem:[%s2741_s17 + $0x10] sm:$0xff]  ;;  %v2236_v53 = vld [vmem:[#allocation4 + $0x200] ss:$8 sps:$4 sm:$0xff]   ;;  %vm1191_vm1 = vcmask 1040384  }
  0x79   : > { %v438_v49 = vld [vmem:[%s2741_s17 + $0x28] sm:$0xff]  ;;  %v443_v51 = vpack.c.bf16 %v435_v48, %v435_v48  ;;  %v2314_v52 = vld [vmem:[#allocation4 + $0x74] ss:$8 sps:$4 sm:$0xff]   ;;  %v2316_v56 = vld [vmem:[#allocation4 + $0x70] ss:$8 sps:$4 sm:$0xff]   ;;  %vm2534_vm2 = vmmov 0  }
  0x7a   : > { %1250 = vmatpush1.bf16.msra.mxu0 %v2202_v9  ;;  %1205 = vmatpush1.bf16.msra.mxu1 %v2286_v32  ;;  %v446_v54 = vpack.c.bf16 %v438_v49, %v438_v49  ;;  %v2241_v55 = vld [vmem:[#allocation4 + $0x214] ss:$8 sps:$4 sm:$0xff]   ;;  %v2320_v57 = vld [vmem:[#allocation4 + $0x84] ss:$8 sps:$4 sm:$0xff]   ;;  %v2239_v58 = vld [vmem:[#allocation4 + $0x210] ss:$8 sps:$4 sm:$0xff]  }
  0x7b   : > { %1251 = vmatprep.subr.bf16.mxu0 %v2203_v10  ;;  %1206 = vmatprep.subr.bf16.mxu1 %v2290_v33  ;;  %v2244_v59 = vld [vmem:[#allocation4 + $0x224] ss:$8 sps:$4 sm:$0xff]   ;;  %v2322_v60 = vld [vmem:[#allocation4 + $0x80] ss:$8 sps:$4 sm:$0xff]   ;;  %v2326_v61 = vld [vmem:[#allocation4 + $0x94] ss:$8 sps:$4 sm:$0xff]  }
  0x7c   : > { %v2242_v62 = vld [vmem:[#allocation4 + $0x220] ss:$8 sps:$4 sm:$0xff]   ;;  %v2247_v63 = vld [vmem:[#allocation4 + $0x234] ss:$8 sps:$4 sm:$0xff]   ;;  %v2328_v0 = vld [vmem:[#allocation4 + $0x90] ss:$8 sps:$4 sm:$0xff]  }
  0x7d   : > { %v2332_v1 = vld [vmem:[#allocation4 + $0xa4] ss:$8 sps:$4 sm:$0xff]   ;;  %v2245_v2 = vld [vmem:[#allocation4 + $0x230] ss:$8 sps:$4 sm:$0xff]   ;;  %v2334_v4 = vld [vmem:[#allocation4 + $0xa0] ss:$8 sps:$4 sm:$0xff]  }
  0x7e   : > { %1252 = vmatpush1.bf16.msra.mxu0 %v2205_v11  ;;  %1207 = vmatpush1.bf16.msra.mxu1 %v2292_v36  ;;  %v2250_v3 = vld [vmem:[#allocation4 + $0x244] ss:$8 sps:$4 sm:$0xff]   ;;  %v2338_v5 = vld [vmem:[#allocation4 + $0xb4] ss:$8 sps:$4 sm:$0xff]   ;;  %v2248_v6 = vld [vmem:[#allocation4 + $0x240] ss:$8 sps:$4 sm:$0xff]  }
  0x7f   : > { %1253 = vmatprep.subr.bf16.mxu0 %v2206_v12  ;;  %1208 = vmatprep.subr.bf16.mxu1 %v2296_v37  ;;  %v2253_v7 = vld [vmem:[#allocation4 + $0x254] ss:$8 sps:$4 sm:$0xff]   ;;  %v2340_v8 = vld [vmem:[#allocation4 + $0xb0] ss:$8 sps:$4 sm:$0xff]   ;;  %v434_v9 = vld [vmem:[%s2741_s17 + $0x8] sm:$0xff]  ;;  %vm1731_vm3 = vcmask 1043456  }
  0x80   : > { %v2344_v10 = vld [vmem:[#allocation4 + $0xc4] ss:$8 sps:$4 sm:$0xff]   ;;  %v442_v11 = vpack.c.bf16 %v434_v9, %v434_v9  ;;  %v2251_v12 = vld [vmem:[#allocation4 + $0x250] ss:$8 sps:$4 sm:$0xff]   ;;  %v2346_v14 = vld [vmem:[#allocation4 + $0xc0] ss:$8 sps:$4 sm:$0xff]  }
  0x81   : > { %v2256_v13 = vld [vmem:[#allocation4 + $0x264] ss:$8 sps:$4 sm:$0xff]   ;;  %v2362_v24 = vld [vmem:[#allocation4 + $0xf4] ss:$8 sps:$4 sm:$0xff]   ;;  %v2287_v49 = vld [vmem:[#allocation4 + $0x2e0] ss:$8 sps:$4 sm:$0xff]  }
  0x82   : > { %1254 = vmatpush1.bf16.msra.mxu0 %v2208_v15  ;;  %1209 = vmatpush1.bf16.msra.mxu1 %v2298_v40  ;;  %v2350_v15 = vld [vmem:[#allocation4 + $0xd4] ss:$8 sps:$4 sm:$0xff]   ;;  %v433_v27 = vld [vmem:[%s2741_s17] sm:$0xff]  ;;  %v2370_v28 = vld [vmem:[#allocation6 + $0x40] sm:$0xff]   ;;  %vm1673_vm4 = vcmask 130048   ;;  %vm1727_vm5 = vcmask 64512  }
  0x83   : > { %1255 = vmatprep.subr.bf16.mxu0 %v2209_v16  ;;  %1210 = vmatprep.subr.bf16.mxu1 %v2302_v41  ;;  %v2254_v16 = vld [vmem:[#allocation4 + $0x260] ss:$8 sps:$4 sm:$0xff]   ;;  %v2265_v25 = vld [vmem:[#allocation4 + $0x294] ss:$8 sps:$4 sm:$0xff]   ;;  %v441_v32 = vpack.c.bf16 %v433_v27, %v433_v27  ;;  %vm1775_vm6 = vcmask 31744   ;;  %p428_p6 = scmp.lt.s32.totalorder %s2614_s21, 1 }
  0x84   : > { %1232 = vmatprep.mubr.bf16.mxu1 %v442_v11  ;;  %v2371_v31 = vld [vmem:[#allocation6] sm:$0xff]   ;;  %v2372_v33 = vld [vmem:[#allocation6 + $0x48] sm:$0xff]   ;;  %v2374_v37 = vld [vmem:[#allocation6 + $0x50] sm:$0xff]   ;;  %s2865_s11 = sld [smem:[#allocation9_spill]] }
  0x85   : > { %v2373_v36 = vld [vmem:[#allocation6 + $0x8] sm:$0xff]   ;;  %v2375_v40 = vld [vmem:[#allocation6 + $0x10] sm:$0xff]   ;;  %v2376_v41 = vld [vmem:[#allocation6 + $0x58] sm:$0xff]   ;;  %s2871_s21 = smov (!%p428_p6, %s2614_s21), 1 }
  0x86   : > { %1256 = vmatpush1.bf16.msra.mxu0 %v2211_v17  ;;  %1211 = vmatpush1.bf16.msra.mxu1 %v2304_v44  ;;  %v2259_v17 = vld [vmem:[#allocation4 + $0x274] ss:$8 sps:$4 sm:$0xff]   ;;  %v2377_v44 = vld [vmem:[#allocation6 + $0x18] sm:$0xff]   ;;  %v2379_v48 = vld [vmem:[#allocation6 + $0x20] sm:$0xff]   ;;  %s1884_s22 = sshll.u32 %s2871_s21, 3 }
  0x87   : > { %1257 = vmatprep.subr.bf16.mxu0 %v2212_v18  ;;  %1212 = vmatprep.subr.bf16.mxu1 %v2308_v46  ;;  %v2257_v18 = vld [vmem:[#allocation4 + $0x270] ss:$8 sps:$4 sm:$0xff]   ;;  %v2347_v9 = vld [vmem:[#allocation4 + $0x380] ss:$8 sps:$4 sm:$0xff]  }
  0x88   : > { %v2281_v46 = vld [vmem:[#allocation4 + $0x2d0] ss:$8 sps:$4 sm:$0xff]  }
  0x89   : > { %v2353_v11 = vld [vmem:[#allocation4 + $0x390] ss:$8 sps:$4 sm:$0xff]  }
  0x8a   : > { %1258 = vmatpush1.bf16.msra.mxu0 %v2214_v19  ;;  %1213 = vmatpush1.bf16.msra.mxu1 %v2310_v50  ;;  %v2352_v19 = vld [vmem:[#allocation4 + $0xd0] ss:$8 sps:$4 sm:$0xff]   ;;  %v2295_v50 = vld [vmem:[#allocation4 + $0x2f4] ss:$8 sps:$4 sm:$0xff]   ;;  %s431_s24 = scalar_lea.vmem %s2865_s11, %s1884_s22 }
  0x8b   : > { %1259 = vmatprep.subr.bf16.mxu0 %v2215_v20  ;;  %1214 = vmatprep.subr.bf16.mxu1 %v2314_v52  ;;  %v2356_v20 = vld [vmem:[#allocation4 + $0xe4] ss:$8 sps:$4 sm:$0xff]   ;;  %v2382_v27 = vld [vmem:[#allocation6 + $0x70] sm:$0xff]  }
  0x8c   : > { %v437_v52 = vld [vmem:[%s2741_s17 + $0x20] sm:$0xff] }
  0x8e   : > { %1260 = vmatpush1.bf16.msra.mxu0 %v2217_v21  ;;  %1215 = vmatpush1.bf16.msra.mxu1 %v2316_v56  ;;  %v2262_v21 = vld [vmem:[#allocation4 + $0x284] ss:$8 sps:$4 sm:$0xff]   ;;  %v2299_v56 = vld [vmem:[#allocation4 + $0x300] ss:$8 sps:$4 sm:$0xff]  }
  0x8f   : > { %1261 = vmatprep.subr.bf16.mxu0 %v2218_v22  ;;  %1216 = vmatprep.subr.bf16.mxu1 %v2320_v57  ;;  %v2358_v22 = vld [vmem:[#allocation4 + $0xe0] ss:$8 sps:$4 sm:$0xff]  }
  0x92   : > { %1262 = vmatpush1.bf16.msra.mxu0 %v2220_v23  ;;  %1217 = vmatpush1.bf16.msra.mxu1 %v2322_v60  ;;  %v2260_v23 = vld [vmem:[#allocation4 + $0x280] ss:$8 sps:$4 sm:$0xff]   ;;  %v2313_v60 = vld [vmem:[#allocation4 + $0x324] ss:$8 sps:$4 sm:$0xff]  }
  0x93   : > { %1263 = vmatprep.subr.bf16.mxu0 %v2221_v26  ;;  %1218 = vmatprep.subr.bf16.mxu1 %v2326_v61  ;;  %v2364_v26 = vld [vmem:[#allocation4 + $0xf0] ss:$8 sps:$4 sm:$0xff]   ;;  %v2311_v61 = vld [vmem:[#allocation4 + $0x320] ss:$8 sps:$4 sm:$0xff]  }
  0x96   : > { %1264 = vmatpush1.bf16.msra.mxu0 %v2223_v29  ;;  %1219 = vmatpush1.bf16.msra.mxu1 %v2328_v0  ;;  %v2263_v29 = vld [vmem:[#allocation4 + $0x290] ss:$8 sps:$4 sm:$0xff]   ;;  %v2325_v0 = vld [vmem:[#allocation4 + $0x344] ss:$8 sps:$4 sm:$0xff]  }
  0x97   : > { %1265 = vmatprep.subr.bf16.mxu0 %v2224_v30  ;;  %1220 = vmatprep.subr.bf16.mxu1 %v2332_v1  ;;  %v2268_v30 = vld [vmem:[#allocation4 + $0x2a4] ss:$8 sps:$4 sm:$0xff]   ;;  %v2323_v1 = vld [vmem:[#allocation4 + $0x340] ss:$8 sps:$4 sm:$0xff]  }
  0x9a   : > { %1266 = vmatpush1.bf16.msra.mxu0 %v2226_v34  ;;  %1221 = vmatpush1.bf16.msra.mxu1 %v2334_v4  ;;  %v2266_v34 = vld [vmem:[#allocation4 + $0x2a0] ss:$8 sps:$4 sm:$0xff]   ;;  %v2337_v4 = vld [vmem:[#allocation4 + $0x364] ss:$8 sps:$4 sm:$0xff]  }
  0x9b   : > { %1267 = vmatprep.subr.bf16.mxu0 %v2227_v35  ;;  %1222 = vmatprep.subr.bf16.mxu1 %v2338_v5  ;;  %v2271_v35 = vld [vmem:[#allocation4 + $0x2b4] ss:$8 sps:$4 sm:$0xff]   ;;  %v2335_v5 = vld [vmem:[#allocation4 + $0x360] ss:$8 sps:$4 sm:$0xff]  }
  0x9e   : > { %1268 = vmatpush1.bf16.msra.mxu0 %v2229_v38  ;;  %1223 = vmatpush1.bf16.msra.mxu1 %v2340_v8  ;;  %v2269_v38 = vld [vmem:[#allocation4 + $0x2b0] ss:$8 sps:$4 sm:$0xff]   ;;  %v2349_v8 = vld [vmem:[#allocation4 + $0x384] ss:$8 sps:$4 sm:$0xff]  }
  0x9f   : > { %1269 = vmatprep.subr.bf16.mxu0 %v2230_v39  ;;  %1224 = vmatprep.subr.bf16.mxu1 %v2344_v10  ;;  %v2277_v39 = vld [vmem:[#allocation4 + $0x2c4] ss:$8 sps:$4 sm:$0xff]   ;;  %v2355_v10 = vld [vmem:[#allocation4 + $0x394] ss:$8 sps:$4 sm:$0xff]  }
  0xa2   : > { %1270 = vmatpush1.bf16.msra.mxu0 %v2232_v42  ;;  %1225 = vmatpush1.bf16.msra.mxu1 %v2346_v14  ;;  %v2275_v42 = vld [vmem:[#allocation4 + $0x2c0] ss:$8 sps:$4 sm:$0xff]  }
  0xa3   : > { %1271 = vmatprep.subr.bf16.mxu0 %v2233_v43  ;;  %1226 = vmatprep.subr.bf16.mxu1 %v2350_v15  ;;  %v2283_v43 = vld [vmem:[#allocation4 + $0x2d4] ss:$8 sps:$4 sm:$0xff]   ;;  %v2359_v14 = vld [vmem:[#allocation4 + $0x3a0] ss:$8 sps:$4 sm:$0xff]  }
  0xa4   : > { %v2367_v15 = vld [vmem:[#allocation4 + $0x3b4] ss:$8 sps:$4 sm:$0xff]  }
  0xa6   : > { %1272 = vmatpush1.bf16.msra.mxu0 %v2235_v45  ;;  %1227 = vmatpush1.bf16.msra.mxu1 %v2352_v19  ;;  %v2378_v45 = vld [vmem:[#allocation6 + $0x60] sm:$0xff]   ;;  %v2365_v19 = vld [vmem:[#allocation4 + $0x3b0] ss:$8 sps:$4 sm:$0xff]  }
  0xa7   : > { %1282 = vmatprep.subr.bf16.mxu0 %v2238_v47  ;;  %1228 = vmatprep.subr.bf16.mxu1 %v2356_v20  ;;  %v2289_v47 = vld [vmem:[#allocation4 + $0x2e4] ss:$8 sps:$4 sm:$0xff]  }
  0xa9   : > { %1274 = vmatmul.mubr.bf16.vlgmr.msra.gmra.mrb[0].mxu0 %v443_v51  ;;  %v2293_v51 = vld [vmem:[#allocation4 + $0x2f0] ss:$8 sps:$4 sm:$0xff]  }
  0xaa   : > { %1283 = vmatpush1.bf16.msra.mxu0 %v2236_v53  ;;  %1314 = vmatprep.mubr.bf16.mxu0 %v446_v54  ;;  %v2301_v53 = vld [vmem:[#allocation4 + $0x304] ss:$8 sps:$4 sm:$0xff]   ;;  %v440_v54 = vld [vmem:[%s2741_s17 + $0x38] sm:$0xff] }
  0xab   : > { %1284 = vmatprep.subr.bf16.mxu0 %v2241_v55  ;;  %1229 = vmatpush1.bf16.msra.mxu1 %v2358_v22  ;;  %v445_v55 = vpack.c.bf16 %v437_v52, %v437_v52  ;;  %v448_v57 = vpack.c.bf16 %v440_v54, %v440_v54  ;;  %v2386_v54 = vld [vmem:[%s2846_s5] sm:$0xff]  }
  0xac   : > { %1230 = vmatprep.subr.bf16.mxu1 %v2362_v24 }
  0xae   : > { %1285 = vmatpush1.bf16.msra.mxu0 %v2239_v58  ;;  %v2307_v58 = vld [vmem:[#allocation4 + $0x314] ss:$8 sps:$4 sm:$0xff]  }
  0xaf   : > { %1286 = vmatprep.subr.bf16.mxu0 %v2244_v59  ;;  %1231 = vmatpush1.bf16.msra.mxu1 %v2364_v26  ;;  %v2305_v59 = vld [vmem:[#allocation4 + $0x310] ss:$8 sps:$4 sm:$0xff]  }
  0xb0   : > { %2042 = vmatprep.subr.bf16.mxu1 %v2370_v28  ;;  %v2381_v26 = vld [vmem:[#allocation6 + $0x28] sm:$0xff]   ;;  %v2383_v28 = vld [vmem:[#allocation6 + $0x30] sm:$0xff]  }
  0xb2   : > { %1287 = vmatpush1.bf16.msra.mxu0 %v2242_v62  ;;  %1233 = vmatmul.mubr.bf16.vlgmr.msra.gmra.mrb[0].mxu1 %v441_v32  ;;  %v2319_v62 = vld [vmem:[#allocation4 + $0x334] ss:$8 sps:$4 sm:$0xff]  }
  0xb3   : > { %1288 = vmatprep.subr.bf16.mxu0 %v2247_v63  ;;  %2043 = vmatpush3.bf16.msra.mxu1 %v2371_v31  ;;  %v2317_v63 = vld [vmem:[#allocation4 + $0x330] ss:$8 sps:$4 sm:$0xff]   ;;  %v2533_v31 = vmov 0.0  }
  0xb4   : > { %2044 = vmatprep.subr.bf16.mxu1 %v2372_v33 }
  0xb6   : > { %1289 = vmatpush1.bf16.msra.mxu0 %v2245_v2  ;;  %v2331_v2 = vld [vmem:[#allocation4 + $0x354] ss:$8 sps:$4 sm:$0xff]  }
  0xb7   : > { %1290 = vmatprep.subr.bf16.mxu0 %v2250_v3  ;;  %2045 = vmatpush3.bf16.msra.mxu1 %v2373_v36  ;;  %v2329_v3 = vld [vmem:[#allocation4 + $0x350] ss:$8 sps:$4 sm:$0xff]   ;;  %v572_v36 = vlaneseq }
  0xb8   : > { %2046 = vmatprep.subr.bf16.mxu1 %v2374_v37 }
  0xb9   : > { %v573_v37 = vshrl.u32 %v572_v36, 7 }
  0xba   : > { %1291 = vmatpush1.bf16.msra.mxu0 %v2248_v6  ;;  %v2343_v6 = vld [vmem:[#allocation4 + $0x374] ss:$8 sps:$4 sm:$0xff]  }
  0xbb   : > { %1292 = vmatprep.subr.bf16.mxu0 %v2253_v7  ;;  %2047 = vmatpush3.bf16.msra.mxu1 %v2375_v40  ;;  %v2341_v7 = vld [vmem:[#allocation4 + $0x370] ss:$8 sps:$4 sm:$0xff]   ;;  %v578_v40 = vsub.s32 1, %v573_v37 }
  0xbc   : > { %2048 = vmatprep.subr.bf16.mxu1 %v2376_v41 }
  0xbe   : > { %1293 = vmatpush1.bf16.msra.mxu0 %v2251_v12  ;;  %v2361_v12 = vld [vmem:[#allocation4 + $0x3a4] ss:$8 sps:$4 sm:$0xff]  }
  0xbf   : > { %1294 = vmatprep.subr.bf16.mxu0 %v2256_v13  ;;  %2049 = vmatpush3.bf16.msra.mxu1 %v2377_v44  ;;  %v569_v13 = vld [vmem:[#allocation4 + $0x3c0] sm:$0x11] }
  0xc0   : > { %2050 = vmatprep.subr.bf16.mxu1 %v2378_v45  ;;  %v2005_v20 = vcombine.low %v569_v13, %v569_v13 }
  0xc2   : > { %1295 = vmatpush1.bf16.msra.mxu0 %v2254_v16  ;;  %v2006_v16 = vcombine.high %v569_v13, %v569_v13 }
  0xc3   : > { %1296 = vmatprep.subr.bf16.mxu0 %v2259_v17  ;;  %2051 = vmatpush3.bf16.msra.mxu1 %v2379_v48  ;;  %v2532_v17 = vmov 0  }
  0xc6   : > { %1297 = vmatpush1.bf16.msra.mxu0 %v2257_v18  ;;  %v1193_v18 = vsel %vm1191_vm1, 65535, %v2532_v17 }
  0xc7   : > { %1298 = vmatprep.subr.bf16.mxu0 %v2262_v21  ;;  %v1198_v21 = vand.u32 %v2006_v16, %v1193_v18  ;;  %v1195_v22 = vand.u32 %v2005_v20, %v1193_v18 }
  0xca   : > { %1299 = vmatpush1.bf16.msra.mxu0 %v2260_v23  ;;  %v439_v23 = vld [vmem:[%s2741_s17 + $0x30] sm:$0xff] }
  0xcb   : > { %1300 = vmatprep.subr.bf16.mxu0 %v2265_v25  ;;  %v447_v24 = vpack.c.bf16 %v439_v23, %v439_v23  ;;  %v2380_v25 = vld [vmem:[#allocation6 + $0x68] sm:$0xff]  }
  0xcc   : > { %2052 = vmatprep.subr.bf16.mxu1 %v2380_v25 }
  0xcd   : > { %2053 = vmatpush3.bf16.msra.mxu1 %v2381_v26 }
  0xce   : > { %1301 = vmatpush1.bf16.msra.mxu0 %v2263_v29  ;;  %2054 = vmatprep.subr.bf16.mxu1 %v2382_v27  ;;  %v2384_v29 = vld [vmem:[#allocation6 + $0x78] sm:$0xff]  }
  0xcf   : > { %1302 = vmatprep.subr.bf16.mxu0 %v2268_v30  ;;  %v2385_v30 = vld [vmem:[#allocation6 + $0x38] sm:$0xff]  }
  0xd0   : > { %v2037_v27 = vld [vmem:[%s2851_s10] ss:$0 sm:$0xff] }
  0xd1   : > { %2055 = vmatpush3.bf16.msra.mxu1 %v2383_v28 }
  0xd2   : > { %1303 = vmatpush1.bf16.msra.mxu0 %v2266_v34  ;;  %2056 = vmatprep.subr.bf16.mxu1 %v2384_v29 }
  0xd3   : > { %1304 = vmatprep.subr.bf16.mxu0 %v2271_v35 }
  0xd5   : > { %2057 = vmatpush3.bf16.msra.mxu1 %v2385_v30 }
  0xd6   : > { %1305 = vmatpush1.bf16.msra.mxu0 %v2269_v38  ;;  %2077 = vmatprep.subr.bf16.mxu1 %v2533_v31  ;;  %v574_v38 = vsub.s32 0, %v573_v37 }
  0xd7   : > { %1306 = vmatprep.subr.bf16.mxu0 %v2277_v39  ;;  %v570_v39 = vld [vmem:[%s2843_s2] sm:$0x3] }
  0xd8   : > { %v575_v41 = vrot.slane %v570_v39, %v574_v38 }
  0xda   : > { %1307 = vmatpush1.bf16.msra.mxu0 %v2275_v42  ;;  %v579_v42 = vrot.slane %v570_v39, %v578_v40 }
  0xdb   : > { %1308 = vmatprep.subr.bf16.mxu0 %v2283_v43 }
  0xde   : > { %1309 = vmatpush1.bf16.msra.mxu0 %v2281_v46 }
  0xdf   : > { %1310 = vmatprep.subr.bf16.mxu0 %v2289_v47 }
  0xe2   : > { %1311 = vmatpush1.bf16.msra.mxu0 %v2287_v49 }
  0xe3   : > { %1312 = vmatprep.subr.bf16.mxu0 %v2295_v50 }
  0xe6   : > { %1313 = vmatpush1.bf16.msra.mxu0 %v2293_v51 }
  0xe7   : > { %1323 = vmatprep.subr.bf16.mxu0 %v2301_v53 }
  0xe9   : > { %1315 = vmatmul.mubr.bf16.vlgmr.msra.gmra.mrb[0].mxu0 %v445_v55 }
  0xea   : > { %1324 = vmatpush1.bf16.msra.mxu0 %v2299_v56  ;;  %2007 = vmatprep.mubr.msk.bf16.mxu0 %vm1187_vm0, %v448_v57  ;;  %v2387_v56 = vld [vmem:[%s2846_s5 + $0x8] sm:$0xff]   ;;  %v2388_v57 = vld [vmem:[%s2846_s5 + $0x10] sm:$0xff]  }
  0xeb   : > { %1325 = vmatprep.subr.bf16.mxu0 %v2307_v58  ;;  %v2389_v58 = vld [vmem:[%s2846_s5 + $0x18] sm:$0xff]  }
  0xee   : > { %1326 = vmatpush1.bf16.msra.mxu0 %v2305_v59  ;;  %v2390_v59 = vld [vmem:[%s2846_s5 + $0x20] sm:$0xff]  }
  0xef   : > { %1327 = vmatprep.subr.bf16.mxu0 %v2313_v60  ;;  %v2391_v60 = vld [vmem:[%s2846_s5 + $0x28] sm:$0xff]  }
  0xf2   : > { %1328 = vmatpush1.bf16.msra.mxu0 %v2311_v61  ;;  %v2392_v61 = vld [vmem:[%s2846_s5 + $0x30] sm:$0xff]  }
  0xf3   : > { %1329 = vmatprep.subr.bf16.mxu0 %v2319_v62  ;;  %v2393_v62 = vld [vmem:[%s2846_s5 + $0x38] sm:$0xff]  }
  0xf6   : > { %1330 = vmatpush1.bf16.msra.mxu0 %v2317_v63 }
  0xf7   : > { %1331 = vmatprep.subr.bf16.mxu0 %v2325_v0  ;;  %v2008_v0 = vld [vmem:[%s2845_s4] ss:$0 sm:$0xff] }
  0xfa   : > { %1332 = vmatpush1.bf16.msra.mxu0 %v2323_v1 }
  0xfb   : > { %1333 = vmatprep.subr.bf16.mxu0 %v2331_v2 }
  0xfe   : > { %1334 = vmatpush1.bf16.msra.mxu0 %v2329_v3 }
  0xff   : > { %1335 = vmatprep.subr.bf16.mxu0 %v2337_v4 }
 0x102   : > { %1336 = vmatpush1.bf16.msra.mxu0 %v2335_v5 }
 0x103   : > { %1337 = vmatprep.subr.bf16.mxu0 %v2343_v6 }
 0x106   : > { %1338 = vmatpush1.bf16.msra.mxu0 %v2341_v7  ;;  %v2394_v7 = vld [vmem:[%s2848_s7] sm:$0xff]  }
 0x107   : > { %1339 = vmatprep.subr.bf16.mxu0 %v2349_v8 }
 0x10a   : > { %1340 = vmatpush1.bf16.msra.mxu0 %v2347_v9  ;;  %v2025_v9 = vld [vmem:[%s2847_s6] ss:$0 sm:$0xff] }
 0x10b   : > { %1341 = vmatprep.subr.bf16.mxu0 %v2355_v10 }
 0x10e   : > { %1342 = vmatpush1.bf16.msra.mxu0 %v2353_v11 }
 0x10f   : > { %1343 = vmatprep.subr.bf16.mxu0 %v2361_v12 }
 0x112   : > { %1344 = vmatpush1.bf16.msra.mxu0 %v2359_v14  ;;  %v1719_v14 = vld [vmem:[%s2850_s9] sm:$0xf] }
 0x113   : > { %1345 = vmatprep.subr.bf16.mxu0 %v2367_v15  ;;  %v1733_v18 = vsel %vm1731_vm3, %v1719_v14, 0 }
 0x116   : > { %1346 = vmatpush1.bf16.msra.mxu0 %v2365_v19  ;;  %v2034_v19 = vld [vmem:[%s2849_s8] ss:$0 sm:$0xff] }
 0x117   : > { %1347 = vmatprep.subr.bf16.mxu0 %v1198_v21 }
 0x11a   : > { %1348 = vmatpush1.bf16.msra.mxu0 %v1195_v22 }
 0x11d   : > { %1356 = vmatmul.mubr.bf16.vlgmr.msra.gmra.mrb[0].mxu0 %v447_v24 }
 0x185   : > { %v1234_v32 = vpop.f32.mrb[0].mxu1 }
 0x186   : > { %v1236_v33 = vpop.f32.mrb[1].mxu1  ;;  %v1235_v43 = vadd.f32 %v1234_v32, %v575_v41 }
 0x187   : > { %v1238_v34 = vpop.f32.mrb[2].mxu1  ;;  %v1237_v44 = vadd.f32 %v1236_v33, %v579_v42 }
 0x188   : > { %v1239_v35 = vpop.f32.mrb[3].mxu1 }
 0x1f0   : > { %v1357_v45 = vpop.f32.mrb[0].mxu0 }
 0x1f1   : > { %v2110_v46 = vadd.f32 %v1357_v45, %v1235_v43  ;;  %v1359_v47 = vpop.f32.mrb[1].mxu0 }
 0x1f2   : > { %v2112_v48 = vadd.f32 %v1359_v47, %v1237_v44  ;;  %v1361_v49 = vpop.f32.mrb[2].mxu0 }
 0x1f3   : > { %v1364_v50 = vmax.f32 %v2110_v46, 0.0  ;;  %v1362_v51 = vpop.f32.mrb[3].mxu0 }
 0x1f4   : > { %v1365_v52 = vmax.f32 %v2112_v48, 0.0 }
 0x1f5   : > { %v1366_v55 = vpack.c.bf16 %v1364_v50, %v1364_v50 }
 0x1f6   : > { %v1367_v53 = vpack.c.bf16 %v1365_v52, %v1365_v52 }
 0x1f8   : > { %1535 = vmatprep.mubr.bf16.mxu1 %v1367_v53 }
 0x1f9   : > { %1536 = vmatmul.mubr.bf16.vlgmr.msra.gmra.mrb[4].mxu1 %v1366_v55 }
 0x1fa   : > { %2078 = vmatpush3.bf16.msra.mxu1 %v2386_v54  ;;  %2093 = vmatprep.mubr.msk.bf16.mxu1 %vm2534_vm2, %v2533_v31 }
 0x1fb   : > { %2079 = vmatprep.subr.bf16.mxu1 %v2533_v31 }
 0x1fe   : > { %2080 = vmatpush3.bf16.msra.mxu1 %v2387_v56 }
 0x1ff   : > { %2081 = vmatprep.subr.bf16.mxu1 %v2533_v31 }
 0x202   : > { %2082 = vmatpush3.bf16.msra.mxu1 %v2388_v57 }
 0x203   : > { %2083 = vmatprep.subr.bf16.mxu1 %v2533_v31 }
 0x206   : > { %2084 = vmatpush3.bf16.msra.mxu1 %v2389_v58 }
 0x207   : > { %2085 = vmatprep.subr.bf16.mxu1 %v2533_v31 }
 0x20a   : > { %2086 = vmatpush3.bf16.msra.mxu1 %v2390_v59 }
 0x20b   : > { %2087 = vmatprep.subr.bf16.mxu1 %v2533_v31 }
 0x20e   : > { %2088 = vmatpush3.bf16.msra.mxu1 %v2391_v60 }
 0x20f   : > { %2089 = vmatprep.subr.bf16.mxu1 %v2533_v31 }
 0x212   : > { %2090 = vmatpush3.bf16.msra.mxu1 %v2392_v61 }
 0x213   : > { %2091 = vmatprep.subr.bf16.mxu1 %v2533_v31 }
 0x216   : > { %2092 = vmatpush3.bf16.msra.mxu1 %v2393_v62 }
 0x217   : > { %2097 = vmatprep.subr.bf16.mxu1 %v2533_v31 }
 0x2cc   : > { %v2058_v63 = vpop.f32.mrb[4].mxu1 }
 0x2cd   : > { %v2059_v1 = vpop.f32.mrb[5].mxu1 }
 0x2ce   : > { %v2060_v2 = vadd.f32 %v2059_v1, %v2058_v63  ;;  %v2061_v3 = vpop.f32.mrb[6].mxu1 }
 0x2cf   : > { %v2062_v4 = vpop.f32.mrb[7].mxu1 }
 0x2d0   : > { %v1538_v5 = vadd.f32 %v2060_v2, %v2008_v0 }
 0x2d2   : > { %v1543_v6 = vmax.f32 %v1538_v5, 0.0 }
 0x2d4   : > { %v1544_v8 = vpack.c.bf16 %v1543_v6, %v1543_v6 }
 0x2d6   : > { %2094 = vmatmul.mubr.bf16.vlgmr.msra.gmra.mrb[8].mxu1 %v1544_v8 }
 0x2d7   : > { %2098 = vmatpush3.bf16.msra.mxu1 %v2394_v7  ;;  %2099 = vmatprep.mubr.msk.bf16.mxu1 %vm2534_vm2, %v2533_v31 }
 0x2d8   : > { %2103 = vmatprep.subr.bf16.mxu1 %v2533_v31 }
 0x3a9   : > { %v1650_v10 = vpop.f32.mrb[8].mxu1 }
 0x3aa   : > { %v1651_v11 = vadd.f32 %v2025_v9, %v1650_v10  ;;  %v2095_v12 = vpop.f32.mrb[9].mxu1 }
 0x3ab   : > { %v1653_v13 = vpop.f32.mrb[10].mxu1 }
 0x3ac   : > { %v1656_v15 = vmax.f32 %v1651_v11, 0.0  ;;  %v2096_v16 = vpop.f32.mrb[11].mxu1 }
 0x3ae   : > { %v1657_v17 = vpack.c.bf16 %v1656_v15, %v1656_v15 }
 0x3b0   : > { %2100 = vmatmul.mubr.msk.bf16.vlgmr.msra.gmra.mrb[12].mxu1 %vm1673_vm4, %v1657_v17 }
 0x3b1   : > { %2104 = vmatpush3.bf16.msra.mxu1 %v1733_v18  ;;  %2105 = vmatprep.mubr.msk.bf16.mxu1 %vm2534_vm2, %v2533_v31 }
 0x483   : > { %v1711_v20 = vpop.f32.mrb[12].mxu1 }
 0x484   : > { %v1712_v21 = vadd.f32 %v2034_v19, %v1711_v20  ;;  %v2101_v22 = vpop.f32.mrb[13].mxu1 }
 0x485   : > { %v1714_v23 = vpop.f32.mrb[14].mxu1 }
 0x486   : > { %v1717_v24 = vmax.f32 %v1712_v21, 0.0  ;;  %v2102_v25 = vpop.f32.mrb[15].mxu1 }
 0x488   : > { %v1718_v26 = vpack.c.bf16 %v1717_v24, %v1717_v24 }
 0x48a   : > { %2106 = vmatmul.mubr.msk.bf16.vlgmr.msra.gmra.mrb[16].mxu1 %vm1727_vm5, %v1718_v26 }
 0x55d   : > { %v1769_v28 = vpop.f32.mrb[16].mxu1 }
 0x55e   : > { %v1770_v29 = vadd.f32 %v2037_v27, %v1769_v28  ;;  %v2107_v30 = vpop.f32.mrb[17].mxu1 }
 0x55f   : > { %v1772_v31 = vpop.f32.mrb[18].mxu1 }
 0x560   : > { %v2108_v32 = vpop.f32.mrb[19].mxu1  ;;  %v1776_v33 = vsel %vm1775_vm6, %v1770_v29, -inf }
 0x561   : > { %1777 = vmax.xlane.f32.xlu0 %v1776_v33 }
 0x5ee   : > { %v1778_v34 = vpop.xlane.xlu0 %1777 }
 0x5ef   : > { %v1779_v35 = vsub.f32 %v1770_v29, %v1778_v34 }
 0x5f1   : > { %v1780_v36 = vmul.f32 1.442695, %v1779_v35 }
 0x5f3   : > { %2395 = vpow2.f32 %v1780_v36 }
 0x5fd   : > { %v2396_v37 = vpop.eup %2395 }
 0x5fe   : > { %v1782_v38 = vsel %vm1775_vm6, %v2396_v37, 0.0 }
 0x5ff   : > { %1783 = vadd.xlane.f32.xlu0 %v1782_v38 }
 0x68c   : > { %v1784_v39 = vpop.xlane.xlu0 %1783 }
 0x68d   : > { %2397 = vrcp.f32 %v1784_v39 }
 0x697   : > { %v2398_v40 = vpop.eup %2397 }
 0x698   : > { %v1786_v41 = vmul.f32 %v2398_v40, %v2396_v37 }
 0x69a   : > { %1787 = vst.msk [vmem:[%s431_s24] sm:$0xff] %vm1775_vm6, %v1786_v41 }
 0x69b PF: > { %p22_p9 = scmp.ge.s32.totalorder %s2688_s30, 4   ;;  %s2866_s17 = smov %s2515_s18 }
 0x69c   : > { %s2867_s18 = smov %s2519_s19  ;;  %s2868_s19 = smov %s2697_s14 }
 0x69d   : > { %s2869_s20 = smov %s2688_s30  ;;  %24 = sbr.rel (!%p22_p9) target bundleno = 6 (0x6), region = 112 }
 0x6a4   :  { %1807 = vsyncpa [#allocation3], 1 }
 0x6a5   :  { %1809 = vsyncpa [#allocation3 + $0x1], 1 }
 0x6a6   :  { %1810 = vsyncpa [#allocation5], 1 }

// kernel: tpu_custom_call.1
= control target key start
LH: loop header
LB: loop body
LE: loop exit
PB: predicated region body
PF: predicated region fallthrough
CT: control target
= control target key end

     0   :  { %s2841_s0 = inlined_call_operand.hbm [shape: f32[16,961], index: 0, kind: input, shape index: {}]   ;;  %s2842_s1 = inlined_call_operand.hbm [shape: bf16[961,256], index: 1, kind: input, shape index: {}]   ;;  %s2843_s2 = inlined_call_operand.vmem [shape: f32[1,256], index: 2, kind: input, shape index: {}]   ;;  %s2844_s3 = inlined_call_operand.hbm [shape: bf16[256,128], index: 3, kind: input, shape index: {}]   ;;  %s2845_s4 = inlined_call_operand.vmem [shape: f32[1,128], index: 4, kind: input, shape index: {}]   ;;  %s2846_s5 = inlined_call_operand.vmem [shape: bf16[128,16], index: 5, kind: input, shape index: {}]   ;;  %s2847_s6 = inlined_call_operand.vmem [shape: f32[1,16], index: 6, kind: input, shape index: {}]   ;;  %s2848_s7 = inlined_call_operand.vmem [shape: bf16[16,8], index: 7, kind: input, shape index: {}]   ;;  %s2849_s8 = inlined_call_operand.vmem [shape: f32[1,8], index: 8, kind: input, shape index: {}]   ;;  %s2850_s9 = inlined_call_operand.vmem [shape: bf16[8,4], index: 9, kind: input, shape index: {}]   ;;  %s2851_s10 = inlined_call_operand.vmem [shape: f32[1,4], index: 10, kind: input, shape index: {}]   ;;  %s2852_s11 = inlined_call_operand.vmem [shape: f32[16,4], index: 11, kind: output, shape index: {}]  }
   0x1   :  { %2856 = sst [smem:[#allocation9_spill]] %s2852_s11 }
   0x2   :  { %16 = vsyncpa [#allocation3], 0 }
   0x3   :  { %18 = vsyncpa [#allocation3 + $0x1], 0 }
   0x4   :  { %19 = vsyncpa [#allocation5], 0  ;;  %s2595_s17 = smov 0   ;;  %s2597_s18 = smov 0  }
   0x5   :  { %s2599_s19 = smov 0   ;;  %s2601_s20 = smov 0  }
   0x6 LB: > { %s2614_s21 = sadd.s32 4294967295, %s2523_s20   ;;  %p45_p0 = scmp.ne.s32.totalorder %s2515_s18, %s2511_s17  ;;  %s2523_s20 = sphi %s2601_s20, %s2869_s20   ;;  %s2519_s19 = sphi %s2599_s19, %s2868_s19   ;;  %s2515_s18 = sphi %s2597_s18, %s2867_s18   ;;  %s2511_s17 = sphi %s2595_s17, %s2866_s17  }
   0x7   : > { %p2853_p1 = scmp.eq.s32.totalorder %s2614_s21, 0  ;;  %p1873_p2 = scmp.ge.s32.totalorder %s2523_s20, 1 }
   0x8   : > { %p292_p3 = scmp.lt.s32.totalorder %s2523_s20, 3  ;;  %s2525_s24 = smov [#allocation4]  }
   0x9   : > { %p2622_p4 = por %p2853_p1, %p45_p0  ;;  %s304_s25 = sshll.u32 %s2525_s24, 4  ;;  %s305_s25 = int_to_ptr.vmem [resolvable:$true] %s304_s25 }
   0xa   : > { %p2626_p5 = pnand %p1873_p2, %p292_p3  ;;  %s2526_s27 = smov [#allocation6]  }
   0xb   : > { %s2857_s22 = scalar_select %p2622_p4, 1, 0 }
   0xc   : > { %s2858_s23 = scalar_select %p2626_p5, 1, 0 }
   0xd   : > { %p2131_p6 = pneg %p2626_p5  ;;  %s320_s28 = sshll.u32 %s2526_s27, 4  ;;  %s2638_s28 = int_to_ptr.vmem [resolvable:$true] %s320_s28 }
   0xe   : > { %s2399_s12 = scalar_lea.hbm %s2842_s1, 15488 }
   0xf   : > { %p2634_p7 = pnand %p2131_p6, %p2853_p1  ;;  %p2400_p8 = scmp.ne.s32.totalorder %s2842_s1, %s2399_s12 }
  0x10   : > { %p2406_p12 = scmp.lt.u32.totalorder %s2399_s12, %s2842_s1 }
  0x11   : > { %p2401_p9 = pneg %p2634_p7 }
  0x13   : > { %p2402_p10 = pnand %p2401_p9, %p2400_p8 }
  0x15   : > { %p2403_p11 = pneg %p2402_p10 }
  0x17   : > { %p2408_p13 = pnand %p2406_p12, %p2403_p11 }
  0x19   : > { %2411 = shalt.err (!%p2408_p13)
}
  0x1a   : > { %s2412_s17 = scalar_lea.vmem %s305_s25, 15488  ;;  %p2420_p6 = scmp.lt.s32.totalorder %s305_s25, %s305_s25 }
  0x1b   : > { %p2413_p0 = scmp.ne.s32.totalorder %s305_s25, %s2412_s17  ;;  %p2421_p1 = scmp.lt.s32.totalorder %s2412_s17, %s2412_s17 }
  0x1d   : > { %p2415_p2 = pnand %p2413_p0, %p2401_p9  ;;  %p2422_p4 = por %p2421_p1, %p2420_p6 }
  0x1f   : > { %p2416_p3 = pneg %p2415_p2 }
  0x21   : > { %p2423_p5 = pnand %p2422_p4, %p2416_p3 }
  0x23   : > { %2426 = shalt.err (!%p2423_p5)
}
  0x24   : > { %s2527_s24 = smov 128   ;;  %s2528_s27 = smov 8  }
  0x25   : > { %2134 = dma.hbm_to_vmem [thread:$0]  (!%p2634_p7), %s2842_s1, 15488, %s305_s25, [#allocation5], %s2527_s24, %s2527_s24, %s2528_s27  }
  0x26   : > { %s2427_s14 = scalar_lea.hbm %s2844_s3, 2048 }
  0x27   : > { %p2428_p8 = scmp.ne.s32.totalorder %s2844_s3, %s2427_s14  ;;  %p2434_p5 = scmp.lt.u32.totalorder %s2427_s14, %s2844_s3 }
  0x29   : > { %p2430_p1 = pnand %p2428_p8, %p2401_p9 }
  0x2b   : > { %p2431_p4 = pneg %p2430_p1 }
  0x2d   : > { %p2436_p10 = pnand %p2434_p5, %p2431_p4 }
  0x2f   : > { %2439 = shalt.err (!%p2436_p10)
}
  0x30   : > { %s2440_s25 = scalar_lea.vmem %s2638_s28, 2048  ;;  %p2448_p0 = scmp.lt.s32.totalorder %s2638_s28, %s2638_s28 }
  0x31   : > { %p2441_p11 = scmp.ne.s32.totalorder %s2638_s28, %s2440_s25  ;;  %p2449_p2 = scmp.lt.s32.totalorder %s2440_s25, %s2440_s25 }
  0x33   : > { %p2443_p12 = pnand %p2441_p11, %p2401_p9  ;;  %p2450_p3 = por %p2449_p2, %p2448_p0 }
  0x35   : > { %p2444_p13 = pneg %p2443_p12 }
  0x37   : > { %p2451_p6 = pnand %p2450_p3, %p2444_p13 }
  0x39   : > { %2454 = shalt.err (!%p2451_p6)
}
  0x3a   : > { %s2529_s11 = smov 64   ;;  %s2530_s24 = smov 4  }
  0x3b   : > { %2137 = dma.hbm_to_vmem [thread:$0]  (!%p2634_p7), %s2844_s3, 2048, %s2638_s28, [#allocation5], %s2529_s11, %s2529_s11, %s2530_s24  }
  0x3c   : > { %s2688_s30 = sadd.s32 1, %s2523_s20   ;;  %s32_s13 = sadd.s32 1, %s2519_s19 }
  0x3d   : > { %s29_s12 = ssub.s32 %s2523_s20, %s2688_s30  ;;  %p39_p8 = scmp.ne.s32.totalorder %s2519_s19, %s2515_s18 }
  0x3e   : > { %p30_p9 = scmp.eq.s32.totalorder %s29_s12, 0  ;;  %p40_p1 = scmp.eq.s32.totalorder %s2523_s20, 0 }
  0x3f   : > { %p2144_p5 = scmp.lt.s32.totalorder %s2523_s20, 2  ;;  %s355_s15 = sand.u32 1, %s2519_s19  }
  0x40   : > { %s2697_s14 = scalar_select %p30_p9, %s2519_s19, %s32_s13  }
  0x41   : > { %p41_p4 = por %p40_p1, %p39_p8  ;;  %s2041_s16 = sshll.u32 %s2523_s20, 10 }
  0x42   : > { %s1877_s17 = sshll.u32 %s355_s15, 6  ;;  %s2705_s27 = scalar_lea.hbm %s2841_s0, %s2041_s16 }
  0x43   : > { %s359_s28 = scalar_lea.vmem [#allocation2], %s1877_s17  ;;  %p2707_p7 = pnand %p2144_p5, %p41_p4 }
  0x44   : > { %s367_s11 = sshll.u32 %s359_s28, 4  ;;  %s356_s20 = scalar_lea.sflag [#allocation3], %s355_s15  ;;  %s2711_s11 = int_to_ptr.vmem [resolvable:$true] %s367_s11 }
  0x45   : > { %s2455_s29 = scalar_lea.hbm %s2705_s27, 1024  ;;  %p2457_p11 = pneg %p2707_p7 }
  0x46   : > { %p2456_p10 = scmp.ne.s32.totalorder %s2705_s27, %s2455_s29  ;;  %s2460_s16 = scalar_lea.hbm %s2841_s0, 2048 }
  0x47   : > { %p2461_p0 = scmp.lt.u32.totalorder %s2705_s27, %s2841_s0  ;;  %p2462_p2 = scmp.lt.u32.totalorder %s2460_s16, %s2455_s29 }
  0x48   : > { %p2458_p12 = pnand %p2457_p11, %p2456_p10  ;;  %p2464_p6 = scmp.lt.u32.totalorder %s2455_s29, %s2705_s27 }
  0x49   : > { %p2463_p3 = por %p2462_p2, %p2461_p0 }
  0x4a   : > { %p2459_p13 = pneg %p2458_p12 }
  0x4b   : > { %p2465_p9 = por %p2464_p6, %p2463_p3 }
  0x4d   : > { %p2466_p8 = pnand %p2465_p9, %p2459_p13 }
  0x4f   : > { %2469 = shalt.err (!%p2466_p8)
}
  0x50   : > { %s2470_s15 = scalar_lea.vmem %s2711_s11, 1024  ;;  %s2531_s25 = smov [#allocation2]  }
  0x51   : > { %p2471_p1 = scmp.ne.s32.totalorder %s2711_s11, %s2470_s15  ;;  %s2475_s28 = sshll.u32 %s2531_s25, 4  ;;  %s2476_s28 = int_to_ptr.vmem [resolvable:$false] %s2475_s28 }
  0x52   : > { %s2477_s12 = scalar_lea.vmem %s2476_s28, 2048  ;;  %p2478_p10 = scmp.lt.s32.totalorder %s2711_s11, %s2476_s28 }
  0x53   : > { %p2473_p4 = pnand %p2471_p1, %p2457_p11  ;;  %p2479_p12 = scmp.lt.s32.totalorder %s2477_s12, %s2470_s15 }
  0x55   : > { %p2474_p5 = pneg %p2473_p4  ;;  %p2480_p0 = por %p2479_p12, %p2478_p10 }
  0x57   : > { %p2481_p2 = pnand %p2480_p0, %p2474_p5 }
  0x59   : > { %2484 = shalt.err (!%p2481_p2)
}
  0x5a   : > { %2141 = dma.hbm_to_vmem [thread:$0]  (!%p2707_p7), %s2705_s27, 1024, %s2711_s11, %s356_s20  }
  0x5b   : > { %p2861_p13 = scmp.ne.s32.totalorder %s2858_s23, 0 }
  0x5c   : > { %s378_s29 = sand.u32 (!%p2861_p13), 1, %s2515_s18   ;;  %p2862_p11 = scmp.ne.s32.totalorder (!%p2861_p13), %s2857_s22, 0 }
  0x5d   : > { %376 = sbr.rel (%p2861_p13) target bundleno = 1691 (0x69b), region = 64  ;;  %s1881_s13 = sshll.u32 (!%p2861_p13), %s378_s29, 6 }
  0x5e   : > { %s379_s16 = scalar_lea.sflag (!%p2861_p13), [#allocation3], %s378_s29  ;;  %s2741_s17 = scalar_lea.vmem (!%p2861_p13), [#allocation2], %s1881_s13 }
  0x64   : > { %2502 = dma.done.wait (%p2862_p11), %s379_s16, 1024  }
  0x65   : > { %2504 = vsyncadd (%p2862_p11), %s379_s16, 4294966272  ;;  %p2863_p3 = scmp.eq.s32.totalorder %s2614_s21, 0 }
  0x67   : > { %2506 = dma.done.wait (%p2863_p3), [#allocation5], 17536   ;;  %p2864_p7 = pmov %p2863_p3 }
  0x68   : > { %v2188_v0 = vld [vmem:[#allocation4 + $0x104] ss:$8 sps:$4 sm:$0xff]   ;;  %v2190_v1 = vld [vmem:[#allocation4 + $0x100] ss:$8 sps:$4 sm:$0xff]   ;;  %v2191_v2 = vld [vmem:[#allocation4 + $0x114] ss:$8 sps:$4 sm:$0xff]  }
  0x69   : > { %2508 = vsyncadd (%p2864_p7), [#allocation5], 4294949760  ;;  %1241 = vmatprep.subr.bf16.mxu0 %v2188_v0  ;;  %v2193_v3 = vld [vmem:[#allocation4 + $0x110] ss:$8 sps:$4 sm:$0xff]   ;;  %v2194_v4 = vld [vmem:[#allocation4 + $0x124] ss:$8 sps:$4 sm:$0xff]  }
  0x6a   : > { %1242 = vmatpush1.bf16.msra.mxu0 %v2190_v1  ;;  %v2196_v5 = vld [vmem:[#allocation4 + $0x120] ss:$8 sps:$4 sm:$0xff]   ;;  %v2197_v6 = vld [vmem:[#allocation4 + $0x134] ss:$8 sps:$4 sm:$0xff]   ;;  %v2199_v7 = vld [vmem:[#allocation4 + $0x130] ss:$8 sps:$4 sm:$0xff]  }
  0x6b   : > { %1243 = vmatprep.subr.bf16.mxu0 %v2191_v2  ;;  %v2200_v8 = vld [vmem:[#allocation4 + $0x144] ss:$8 sps:$4 sm:$0xff]   ;;  %v2202_v9 = vld [vmem:[#allocation4 + $0x140] ss:$8 sps:$4 sm:$0xff]   ;;  %v2203_v10 = vld [vmem:[#allocation4 + $0x154] ss:$8 sps:$4 sm:$0xff]  }
  0x6c   : > { %v2205_v11 = vld [vmem:[#allocation4 + $0x150] ss:$8 sps:$4 sm:$0xff]   ;;  %v2206_v12 = vld [vmem:[#allocation4 + $0x164] ss:$8 sps:$4 sm:$0xff]   ;;  %v2208_v15 = vld [vmem:[#allocation4 + $0x160] ss:$8 sps:$4 sm:$0xff]  }
  0x6d   : > { %v436_v13 = vld [vmem:[%s2741_s17 + $0x18] sm:$0xff]  ;;  %v2212_v18 = vld [vmem:[#allocation4 + $0x184] ss:$8 sps:$4 sm:$0xff]   ;;  %v2214_v19 = vld [vmem:[#allocation4 + $0x180] ss:$8 sps:$4 sm:$0xff]   ;;  %vm1187_vm0 = vcmask 531456  }
  0x6e   : > { %1244 = vmatpush1.bf16.msra.mxu0 %v2193_v3  ;;  %v444_v14 = vpack.c.bf16 %v436_v13, %v436_v13  ;;  %v2209_v16 = vld [vmem:[#allocation4 + $0x174] ss:$8 sps:$4 sm:$0xff]   ;;  %v2211_v17 = vld [vmem:[#allocation4 + $0x170] ss:$8 sps:$4 sm:$0xff]   ;;  %v2218_v22 = vld [vmem:[#allocation4 + $0x1a4] ss:$8 sps:$4 sm:$0xff]  }
  0x6f   : > { %1245 = vmatprep.subr.bf16.mxu0 %v2194_v4  ;;  %v2215_v20 = vld [vmem:[#allocation4 + $0x194] ss:$8 sps:$4 sm:$0xff]   ;;  %v2217_v21 = vld [vmem:[#allocation4 + $0x190] ss:$8 sps:$4 sm:$0xff]   ;;  %v2220_v23 = vld [vmem:[#allocation4 + $0x1a0] ss:$8 sps:$4 sm:$0xff]  }
  0x70   : > { %1273 = vmatprep.mubr.bf16.mxu0 %v444_v14  ;;  %v2272_v24 = vld [vmem:[#allocation4 + $0x4] ss:$8 sps:$4 sm:$0xff]   ;;  %v2274_v25 = vld [vmem:[#allocation4] ss:$8 sps:$4 sm:$0xff]   ;;  %v2221_v26 = vld [vmem:[#allocation4 + $0x1b4] ss:$8 sps:$4 sm:$0xff]  }
  0x71   : > { %1200 = vmatprep.subr.bf16.mxu1 %v2272_v24  ;;  %v2278_v27 = vld [vmem:[#allocation4 + $0x14] ss:$8 sps:$4 sm:$0xff]   ;;  %v2280_v28 = vld [vmem:[#allocation4 + $0x10] ss:$8 sps:$4 sm:$0xff]   ;;  %v2224_v30 = vld [vmem:[#allocation4 + $0x1c4] ss:$8 sps:$4 sm:$0xff]  }
  0x72   : > { %1246 = vmatpush1.bf16.msra.mxu0 %v2196_v5  ;;  %1201 = vmatpush1.bf16.msra.mxu1 %v2274_v25  ;;  %v2223_v29 = vld [vmem:[#allocation4 + $0x1b0] ss:$8 sps:$4 sm:$0xff]   ;;  %v2284_v31 = vld [vmem:[#allocation4 + $0x24] ss:$8 sps:$4 sm:$0xff]   ;;  %v2286_v32 = vld [vmem:[#allocation4 + $0x20] ss:$8 sps:$4 sm:$0xff]  }
  0x73   : > { %1247 = vmatprep.subr.bf16.mxu0 %v2197_v6  ;;  %1202 = vmatprep.subr.bf16.mxu1 %v2278_v27  ;;  %v2290_v33 = vld [vmem:[#allocation4 + $0x34] ss:$8 sps:$4 sm:$0xff]   ;;  %v2226_v34 = vld [vmem:[#allocation4 + $0x1c0] ss:$8 sps:$4 sm:$0xff]   ;;  %v2292_v36 = vld [vmem:[#allocation4 + $0x30] ss:$8 sps:$4 sm:$0xff]  }
  0x74   : > { %v2227_v35 = vld [vmem:[#allocation4 + $0x1d4] ss:$8 sps:$4 sm:$0xff]   ;;  %v2296_v37 = vld [vmem:[#allocation4 + $0x44] ss:$8 sps:$4 sm:$0xff]   ;;  %v2229_v38 = vld [vmem:[#allocation4 + $0x1d0] ss:$8 sps:$4 sm:$0xff]  }
  0x75   : > { %v2230_v39 = vld [vmem:[#allocation4 + $0x1e4] ss:$8 sps:$4 sm:$0xff]   ;;  %v2298_v40 = vld [vmem:[#allocation4 + $0x40] ss:$8 sps:$4 sm:$0xff]   ;;  %v2302_v41 = vld [vmem:[#allocation4 + $0x54] ss:$8 sps:$4 sm:$0xff]  }
  0x76   : > { %1248 = vmatpush1.bf16.msra.mxu0 %v2199_v7  ;;  %1203 = vmatpush1.bf16.msra.mxu1 %v2280_v28  ;;  %v2232_v42 = vld [vmem:[#allocation4 + $0x1e0] ss:$8 sps:$4 sm:$0xff]   ;;  %v2233_v43 = vld [vmem:[#allocation4 + $0x1f4] ss:$8 sps:$4 sm:$0xff]   ;;  %v2304_v44 = vld [vmem:[#allocation4 + $0x50] ss:$8 sps:$4 sm:$0xff]  }
  0x77   : > { %1249 = vmatprep.subr.bf16.mxu0 %v2200_v8  ;;  %1204 = vmatprep.subr.bf16.mxu1 %v2284_v31  ;;  %v2235_v45 = vld [vmem:[#allocation4 + $0x1f0] ss:$8 sps:$4 sm:$0xff]   ;;  %v2308_v46 = vld [vmem:[#allocation4 + $0x64] ss:$8 sps:$4 sm:$0xff]   ;;  %v2310_v50 = vld [vmem:[#allocation4 + $0x60] ss:$8 sps:$4 sm:$0xff]  }
  0x78   : > { %v2238_v47 = vld [vmem:[#allocation4 + $0x204] ss:$8 sps:$4 sm:$0xff]   ;;  %v435_v48 = vld [vmem:[%s2741_s17 + $0x10] sm:$0xff]  ;;  %v2236_v53 = vld [vmem:[#allocation4 + $0x200] ss:$8 sps:$4 sm:$0xff]   ;;  %vm1191_vm1 = vcmask 1040384  }
  0x79   : > { %v438_v49 = vld [vmem:[%s2741_s17 + $0x28] sm:$0xff]  ;;  %v443_v51 = vpack.c.bf16 %v435_v48, %v435_v48  ;;  %v2314_v52 = vld [vmem:[#allocation4 + $0x74] ss:$8 sps:$4 sm:$0xff]   ;;  %v2316_v56 = vld [vmem:[#allocation4 + $0x70] ss:$8 sps:$4 sm:$0xff]   ;;  %vm2534_vm2 = vmmov 0  }
  0x7a   : > { %1250 = vmatpush1.bf16.msra.mxu0 %v2202_v9  ;;  %1205 = vmatpush1.bf16.msra.mxu1 %v2286_v32  ;;  %v446_v54 = vpack.c.bf16 %v438_v49, %v438_v49  ;;  %v2241_v55 = vld [vmem:[#allocation4 + $0x214] ss:$8 sps:$4 sm:$0xff]   ;;  %v2320_v57 = vld [vmem:[#allocation4 + $0x84] ss:$8 sps:$4 sm:$0xff]   ;;  %v2239_v58 = vld [vmem:[#allocation4 + $0x210] ss:$8 sps:$4 sm:$0xff]  }
  0x7b   : > { %1251 = vmatprep.subr.bf16.mxu0 %v2203_v10  ;;  %1206 = vmatprep.subr.bf16.mxu1 %v2290_v33  ;;  %v2244_v59 = vld [vmem:[#allocation4 + $0x224] ss:$8 sps:$4 sm:$0xff]   ;;  %v2322_v60 = vld [vmem:[#allocation4 + $0x80] ss:$8 sps:$4 sm:$0xff]   ;;  %v2326_v61 = vld [vmem:[#allocation4 + $0x94] ss:$8 sps:$4 sm:$0xff]  }
  0x7c   : > { %v2242_v62 = vld [vmem:[#allocation4 + $0x220] ss:$8 sps:$4 sm:$0xff]   ;;  %v2247_v63 = vld [vmem:[#allocation4 + $0x234] ss:$8 sps:$4 sm:$0xff]   ;;  %v2328_v0 = vld [vmem:[#allocation4 + $0x90] ss:$8 sps:$4 sm:$0xff]  }
  0x7d   : > { %v2332_v1 = vld [vmem:[#allocation4 + $0xa4] ss:$8 sps:$4 sm:$0xff]   ;;  %v2245_v2 = vld [vmem:[#allocation4 + $0x230] ss:$8 sps:$4 sm:$0xff]   ;;  %v2334_v4 = vld [vmem:[#allocation4 + $0xa0] ss:$8 sps:$4 sm:$0xff]  }
  0x7e   : > { %1252 = vmatpush1.bf16.msra.mxu0 %v2205_v11  ;;  %1207 = vmatpush1.bf16.msra.mxu1 %v2292_v36  ;;  %v2250_v3 = vld [vmem:[#allocation4 + $0x244] ss:$8 sps:$4 sm:$0xff]   ;;  %v2338_v5 = vld [vmem:[#allocation4 + $0xb4] ss:$8 sps:$4 sm:$0xff]   ;;  %v2248_v6 = vld [vmem:[#allocation4 + $0x240] ss:$8 sps:$4 sm:$0xff]  }
  0x7f   : > { %1253 = vmatprep.subr.bf16.mxu0 %v2206_v12  ;;  %1208 = vmatprep.subr.bf16.mxu1 %v2296_v37  ;;  %v2253_v7 = vld [vmem:[#allocation4 + $0x254] ss:$8 sps:$4 sm:$0xff]   ;;  %v2340_v8 = vld [vmem:[#allocation4 + $0xb0] ss:$8 sps:$4 sm:$0xff]   ;;  %v434_v9 = vld [vmem:[%s2741_s17 + $0x8] sm:$0xff]  ;;  %vm1731_vm3 = vcmask 1043456  }
  0x80   : > { %v2344_v10 = vld [vmem:[#allocation4 + $0xc4] ss:$8 sps:$4 sm:$0xff]   ;;  %v442_v11 = vpack.c.bf16 %v434_v9, %v434_v9  ;;  %v2251_v12 = vld [vmem:[#allocation4 + $0x250] ss:$8 sps:$4 sm:$0xff]   ;;  %v2346_v14 = vld [vmem:[#allocation4 + $0xc0] ss:$8 sps:$4 sm:$0xff]  }
  0x81   : > { %v2256_v13 = vld [vmem:[#allocation4 + $0x264] ss:$8 sps:$4 sm:$0xff]   ;;  %v2362_v24 = vld [vmem:[#allocation4 + $0xf4] ss:$8 sps:$4 sm:$0xff]   ;;  %v2287_v49 = vld [vmem:[#allocation4 + $0x2e0] ss:$8 sps:$4 sm:$0xff]  }
  0x82   : > { %1254 = vmatpush1.bf16.msra.mxu0 %v2208_v15  ;;  %1209 = vmatpush1.bf16.msra.mxu1 %v2298_v40  ;;  %v2350_v15 = vld [vmem:[#allocation4 + $0xd4] ss:$8 sps:$4 sm:$0xff]   ;;  %v433_v27 = vld [vmem:[%s2741_s17] sm:$0xff]  ;;  %v2370_v28 = vld [vmem:[#allocation6 + $0x40] sm:$0xff]   ;;  %vm1673_vm4 = vcmask 130048   ;;  %vm1727_vm5 = vcmask 64512  }
  0x83   : > { %1255 = vmatprep.subr.bf16.mxu0 %v2209_v16  ;;  %1210 = vmatprep.subr.bf16.mxu1 %v2302_v41  ;;  %v2254_v16 = vld [vmem:[#allocation4 + $0x260] ss:$8 sps:$4 sm:$0xff]   ;;  %v2265_v25 = vld [vmem:[#allocation4 + $0x294] ss:$8 sps:$4 sm:$0xff]   ;;  %v441_v32 = vpack.c.bf16 %v433_v27, %v433_v27  ;;  %vm1775_vm6 = vcmask 31744   ;;  %p428_p6 = scmp.lt.s32.totalorder %s2614_s21, 1 }
  0x84   : > { %1232 = vmatprep.mubr.bf16.mxu1 %v442_v11  ;;  %v2371_v31 = vld [vmem:[#allocation6] sm:$0xff]   ;;  %v2372_v33 = vld [vmem:[#allocation6 + $0x48] sm:$0xff]   ;;  %v2374_v37 = vld [vmem:[#allocation6 + $0x50] sm:$0xff]   ;;  %s2865_s11 = sld [smem:[#allocation9_spill]] }
  0x85   : > { %v2373_v36 = vld [vmem:[#allocation6 + $0x8] sm:$0xff]   ;;  %v2375_v40 = vld [vmem:[#allocation6 + $0x10] sm:$0xff]   ;;  %v2376_v41 = vld [vmem:[#allocation6 + $0x58] sm:$0xff]   ;;  %s2871_s21 = smov (!%p428_p6, %s2614_s21), 1 }
  0x86   : > { %1256 = vmatpush1.bf16.msra.mxu0 %v2211_v17  ;;  %1211 = vmatpush1.bf16.msra.mxu1 %v2304_v44  ;;  %v2259_v17 = vld [vmem:[#allocation4 + $0x274] ss:$8 sps:$4 sm:$0xff]   ;;  %v2377_v44 = vld [vmem:[#allocation6 + $0x18] sm:$0xff]   ;;  %v2379_v48 = vld [vmem:[#allocation6 + $0x20] sm:$0xff]   ;;  %s1884_s22 = sshll.u32 %s2871_s21, 3 }
  0x87   : > { %1257 = vmatprep.subr.bf16.mxu0 %v2212_v18  ;;  %1212 = vmatprep.subr.bf16.mxu1 %v2308_v46  ;;  %v2257_v18 = vld [vmem:[#allocation4 + $0x270] ss:$8 sps:$4 sm:$0xff]   ;;  %v2347_v9 = vld [vmem:[#allocation4 + $0x380] ss:$8 sps:$4 sm:$0xff]  }
  0x88   : > { %v2281_v46 = vld [vmem:[#allocation4 + $0x2d0] ss:$8 sps:$4 sm:$0xff]  }
  0x89   : > { %v2353_v11 = vld [vmem:[#allocation4 + $0x390] ss:$8 sps:$4 sm:$0xff]  }
  0x8a   : > { %1258 = vmatpush1.bf16.msra.mxu0 %v2214_v19  ;;  %1213 = vmatpush1.bf16.msra.mxu1 %v2310_v50  ;;  %v2352_v19 = vld [vmem:[#allocation4 + $0xd0] ss:$8 sps:$4 sm:$0xff]   ;;  %v2295_v50 = vld [vmem:[#allocation4 + $0x2f4] ss:$8 sps:$4 sm:$0xff]   ;;  %s431_s24 = scalar_lea.vmem %s2865_s11, %s1884_s22 }
  0x8b   : > { %1259 = vmatprep.subr.bf16.mxu0 %v2215_v20  ;;  %1214 = vmatprep.subr.bf16.mxu1 %v2314_v52  ;;  %v2356_v20 = vld [vmem:[#allocation4 + $0xe4] ss:$8 sps:$4 sm:$0xff]   ;;  %v2382_v27 = vld [vmem:[#allocation6 + $0x70] sm:$0xff]  }
  0x8c   : > { %v437_v52 = vld [vmem:[%s2741_s17 + $0x20] sm:$0xff] }
  0x8e   : > { %1260 = vmatpush1.bf16.msra.mxu0 %v2217_v21  ;;  %1215 = vmatpush1.bf16.msra.mxu1 %v2316_v56  ;;  %v2262_v21 = vld [vmem:[#allocation4 + $0x284] ss:$8 sps:$4 sm:$0xff]   ;;  %v2299_v56 = vld [vmem:[#allocation4 + $0x300] ss:$8 sps:$4 sm:$0xff]  }
  0x8f   : > { %1261 = vmatprep.subr.bf16.mxu0 %v2218_v22  ;;  %1216 = vmatprep.subr.bf16.mxu1 %v2320_v57  ;;  %v2358_v22 = vld [vmem:[#allocation4 + $0xe0] ss:$8 sps:$4 sm:$0xff]  }
  0x92   : > { %1262 = vmatpush1.bf16.msra.mxu0 %v2220_v23  ;;  %1217 = vmatpush1.bf16.msra.mxu1 %v2322_v60  ;;  %v2260_v23 = vld [vmem:[#allocation4 + $0x280] ss:$8 sps:$4 sm:$0xff]   ;;  %v2313_v60 = vld [vmem:[#allocation4 + $0x324] ss:$8 sps:$4 sm:$0xff]  }
  0x93   : > { %1263 = vmatprep.subr.bf16.mxu0 %v2221_v26  ;;  %1218 = vmatprep.subr.bf16.mxu1 %v2326_v61  ;;  %v2364_v26 = vld [vmem:[#allocation4 + $0xf0] ss:$8 sps:$4 sm:$0xff]   ;;  %v2311_v61 = vld [vmem:[#allocation4 + $0x320] ss:$8 sps:$4 sm:$0xff]  }
  0x96   : > { %1264 = vmatpush1.bf16.msra.mxu0 %v2223_v29  ;;  %1219 = vmatpush1.bf16.msra.mxu1 %v2328_v0  ;;  %v2263_v29 = vld [vmem:[#allocation4 + $0x290] ss:$8 sps:$4 sm:$0xff]   ;;  %v2325_v0 = vld [vmem:[#allocation4 + $0x344] ss:$8 sps:$4 sm:$0xff]  }
  0x97   : > { %1265 = vmatprep.subr.bf16.mxu0 %v2224_v30  ;;  %1220 = vmatprep.subr.bf16.mxu1 %v2332_v1  ;;  %v2268_v30 = vld [vmem:[#allocation4 + $0x2a4] ss:$8 sps:$4 sm:$0xff]   ;;  %v2323_v1 = vld [vmem:[#allocation4 + $0x340] ss:$8 sps:$4 sm:$0xff]  }
  0x9a   : > { %1266 = vmatpush1.bf16.msra.mxu0 %v2226_v34  ;;  %1221 = vmatpush1.bf16.msra.mxu1 %v2334_v4  ;;  %v2266_v34 = vld [vmem:[#allocation4 + $0x2a0] ss:$8 sps:$4 sm:$0xff]   ;;  %v2337_v4 = vld [vmem:[#allocation4 + $0x364] ss:$8 sps:$4 sm:$0xff]  }
  0x9b   : > { %1267 = vmatprep.subr.bf16.mxu0 %v2227_v35  ;;  %1222 = vmatprep.subr.bf16.mxu1 %v2338_v5  ;;  %v2271_v35 = vld [vmem:[#allocation4 + $0x2b4] ss:$8 sps:$4 sm:$0xff]   ;;  %v2335_v5 = vld [vmem:[#allocation4 + $0x360] ss:$8 sps:$4 sm:$0xff]  }
  0x9e   : > { %1268 = vmatpush1.bf16.msra.mxu0 %v2229_v38  ;;  %1223 = vmatpush1.bf16.msra.mxu1 %v2340_v8  ;;  %v2269_v38 = vld [vmem:[#allocation4 + $0x2b0] ss:$8 sps:$4 sm:$0xff]   ;;  %v2349_v8 = vld [vmem:[#allocation4 + $0x384] ss:$8 sps:$4 sm:$0xff]  }
  0x9f   : > { %1269 = vmatprep.subr.bf16.mxu0 %v2230_v39  ;;  %1224 = vmatprep.subr.bf16.mxu1 %v2344_v10  ;;  %v2277_v39 = vld [vmem:[#allocation4 + $0x2c4] ss:$8 sps:$4 sm:$0xff]   ;;  %v2355_v10 = vld [vmem:[#allocation4 + $0x394] ss:$8 sps:$4 sm:$0xff]  }
  0xa2   : > { %1270 = vmatpush1.bf16.msra.mxu0 %v2232_v42  ;;  %1225 = vmatpush1.bf16.msra.mxu1 %v2346_v14  ;;  %v2275_v42 = vld [vmem:[#allocation4 + $0x2c0] ss:$8 sps:$4 sm:$0xff]  }
  0xa3   : > { %1271 = vmatprep.subr.bf16.mxu0 %v2233_v43  ;;  %1226 = vmatprep.subr.bf16.mxu1 %v2350_v15  ;;  %v2283_v43 = vld [vmem:[#allocation4 + $0x2d4] ss:$8 sps:$4 sm:$0xff]   ;;  %v2359_v14 = vld [vmem:[#allocation4 + $0x3a0] ss:$8 sps:$4 sm:$0xff]  }
  0xa4   : > { %v2367_v15 = vld [vmem:[#allocation4 + $0x3b4] ss:$8 sps:$4 sm:$0xff]  }
  0xa6   : > { %1272 = vmatpush1.bf16.msra.mxu0 %v2235_v45  ;;  %1227 = vmatpush1.bf16.msra.mxu1 %v2352_v19  ;;  %v2378_v45 = vld [vmem:[#allocation6 + $0x60] sm:$0xff]   ;;  %v2365_v19 = vld [vmem:[#allocation4 + $0x3b0] ss:$8 sps:$4 sm:$0xff]  }
  0xa7   : > { %1282 = vmatprep.subr.bf16.mxu0 %v2238_v47  ;;  %1228 = vmatprep.subr.bf16.mxu1 %v2356_v20  ;;  %v2289_v47 = vld [vmem:[#allocation4 + $0x2e4] ss:$8 sps:$4 sm:$0xff]  }
  0xa9   : > { %1274 = vmatmul.mubr.bf16.vlgmr.msra.gmra.mrb[0].mxu0 %v443_v51  ;;  %v2293_v51 = vld [vmem:[#allocation4 + $0x2f0] ss:$8 sps:$4 sm:$0xff]  }
  0xaa   : > { %1283 = vmatpush1.bf16.msra.mxu0 %v2236_v53  ;;  %1314 = vmatprep.mubr.bf16.mxu0 %v446_v54  ;;  %v2301_v53 = vld [vmem:[#allocation4 + $0x304] ss:$8 sps:$4 sm:$0xff]   ;;  %v440_v54 = vld [vmem:[%s2741_s17 + $0x38] sm:$0xff] }
  0xab   : > { %1284 = vmatprep.subr.bf16.mxu0 %v2241_v55  ;;  %1229 = vmatpush1.bf16.msra.mxu1 %v2358_v22  ;;  %v445_v55 = vpack.c.bf16 %v437_v52, %v437_v52  ;;  %v448_v57 = vpack.c.bf16 %v440_v54, %v440_v54  ;;  %v2386_v54 = vld [vmem:[%s2846_s5] sm:$0xff]  }
  0xac   : > { %1230 = vmatprep.subr.bf16.mxu1 %v2362_v24 }
  0xae   : > { %1285 = vmatpush1.bf16.msra.mxu0 %v2239_v58  ;;  %v2307_v58 = vld [vmem:[#allocation4 + $0x314] ss:$8 sps:$4 sm:$0xff]  }
  0xaf   : > { %1286 = vmatprep.subr.bf16.mxu0 %v2244_v59  ;;  %1231 = vmatpush1.bf16.msra.mxu1 %v2364_v26  ;;  %v2305_v59 = vld [vmem:[#allocation4 + $0x310] ss:$8 sps:$4 sm:$0xff]  }
  0xb0   : > { %2042 = vmatprep.subr.bf16.mxu1 %v2370_v28  ;;  %v2381_v26 = vld [vmem:[#allocation6 + $0x28] sm:$0xff]   ;;  %v2383_v28 = vld [vmem:[#allocation6 + $0x30] sm:$0xff]  }
  0xb2   : > { %1287 = vmatpush1.bf16.msra.mxu0 %v2242_v62  ;;  %1233 = vmatmul.mubr.bf16.vlgmr.msra.gmra.mrb[0].mxu1 %v441_v32  ;;  %v2319_v62 = vld [vmem:[#allocation4 + $0x334] ss:$8 sps:$4 sm:$0xff]  }
  0xb3   : > { %1288 = vmatprep.subr.bf16.mxu0 %v2247_v63  ;;  %2043 = vmatpush3.bf16.msra.mxu1 %v2371_v31  ;;  %v2317_v63 = vld [vmem:[#allocation4 + $0x330] ss:$8 sps:$4 sm:$0xff]   ;;  %v2533_v31 = vmov 0.0  }
  0xb4   : > { %2044 = vmatprep.subr.bf16.mxu1 %v2372_v33 }
  0xb6   : > { %1289 = vmatpush1.bf16.msra.mxu0 %v2245_v2  ;;  %v2331_v2 = vld [vmem:[#allocation4 + $0x354] ss:$8 sps:$4 sm:$0xff]  }
  0xb7   : > { %1290 = vmatprep.subr.bf16.mxu0 %v2250_v3  ;;  %2045 = vmatpush3.bf16.msra.mxu1 %v2373_v36  ;;  %v2329_v3 = vld [vmem:[#allocation4 + $0x350] ss:$8 sps:$4 sm:$0xff]   ;;  %v572_v36 = vlaneseq }
  0xb8   : > { %2046 = vmatprep.subr.bf16.mxu1 %v2374_v37 }
  0xb9   : > { %v573_v37 = vshrl.u32 %v572_v36, 7 }
  0xba   : > { %1291 = vmatpush1.bf16.msra.mxu0 %v2248_v6  ;;  %v2343_v6 = vld [vmem:[#allocation4 + $0x374] ss:$8 sps:$4 sm:$0xff]  }
  0xbb   : > { %1292 = vmatprep.subr.bf16.mxu0 %v2253_v7  ;;  %2047 = vmatpush3.bf16.msra.mxu1 %v2375_v40  ;;  %v2341_v7 = vld [vmem:[#allocation4 + $0x370] ss:$8 sps:$4 sm:$0xff]   ;;  %v578_v40 = vsub.s32 1, %v573_v37 }
  0xbc   : > { %2048 = vmatprep.subr.bf16.mxu1 %v2376_v41 }
  0xbe   : > { %1293 = vmatpush1.bf16.msra.mxu0 %v2251_v12  ;;  %v2361_v12 = vld [vmem:[#allocation4 + $0x3a4] ss:$8 sps:$4 sm:$0xff]  }
  0xbf   : > { %1294 = vmatprep.subr.bf16.mxu0 %v2256_v13  ;;  %2049 = vmatpush3.bf16.msra.mxu1 %v2377_v44  ;;  %v569_v13 = vld [vmem:[#allocation4 + $0x3c0] sm:$0x11] }
  0xc0   : > { %2050 = vmatprep.subr.bf16.mxu1 %v2378_v45  ;;  %v2005_v20 = vcombine.low %v569_v13, %v569_v13 }
  0xc2   : > { %1295 = vmatpush1.bf16.msra.mxu0 %v2254_v16  ;;  %v2006_v16 = vcombine.high %v569_v13, %v569_v13 }
  0xc3   : > { %1296 = vmatprep.subr.bf16.mxu0 %v2259_v17  ;;  %2051 = vmatpush3.bf16.msra.mxu1 %v2379_v48  ;;  %v2532_v17 = vmov 0  }
  0xc6   : > { %1297 = vmatpush1.bf16.msra.mxu0 %v2257_v18  ;;  %v1193_v18 = vsel %vm1191_vm1, 65535, %v2532_v17 }
  0xc7   : > { %1298 = vmatprep.subr.bf16.mxu0 %v2262_v21  ;;  %v1198_v21 = vand.u32 %v2006_v16, %v1193_v18  ;;  %v1195_v22 = vand.u32 %v2005_v20, %v1193_v18 }
  0xca   : > { %1299 = vmatpush1.bf16.msra.mxu0 %v2260_v23  ;;  %v439_v23 = vld [vmem:[%s2741_s17 + $0x30] sm:$0xff] }
  0xcb   : > { %1300 = vmatprep.subr.bf16.mxu0 %v2265_v25  ;;  %v447_v24 = vpack.c.bf16 %v439_v23, %v439_v23  ;;  %v2380_v25 = vld [vmem:[#allocation6 + $0x68] sm:$0xff]  }
  0xcc   : > { %2052 = vmatprep.subr.bf16.mxu1 %v2380_v25 }
  0xcd   : > { %2053 = vmatpush3.bf16.msra.mxu1 %v2381_v26 }
  0xce   : > { %1301 = vmatpush1.bf16.msra.mxu0 %v2263_v29  ;;  %2054 = vmatprep.subr.bf16.mxu1 %v2382_v27  ;;  %v2384_v29 = vld [vmem:[#allocation6 + $0x78] sm:$0xff]  }
  0xcf   : > { %1302 = vmatprep.subr.bf16.mxu0 %v2268_v30  ;;  %v2385_v30 = vld [vmem:[#allocation6 + $0x38] sm:$0xff]  }
  0xd0   : > { %v2037_v27 = vld [vmem:[%s2851_s10] ss:$0 sm:$0xff] }
  0xd1   : > { %2055 = vmatpush3.bf16.msra.mxu1 %v2383_v28 }
  0xd2   : > { %1303 = vmatpush1.bf16.msra.mxu0 %v2266_v34  ;;  %2056 = vmatprep.subr.bf16.mxu1 %v2384_v29 }
  0xd3   : > { %1304 = vmatprep.subr.bf16.mxu0 %v2271_v35 }
  0xd5   : > { %2057 = vmatpush3.bf16.msra.mxu1 %v2385_v30 }
  0xd6   : > { %1305 = vmatpush1.bf16.msra.mxu0 %v2269_v38  ;;  %2077 = vmatprep.subr.bf16.mxu1 %v2533_v31  ;;  %v574_v38 = vsub.s32 0, %v573_v37 }
  0xd7   : > { %1306 = vmatprep.subr.bf16.mxu0 %v2277_v39  ;;  %v570_v39 = vld [vmem:[%s2843_s2] sm:$0x3] }
  0xd8   : > { %v575_v41 = vrot.slane %v570_v39, %v574_v38 }
  0xda   : > { %1307 = vmatpush1.bf16.msra.mxu0 %v2275_v42  ;;  %v579_v42 = vrot.slane %v570_v39, %v578_v40 }
  0xdb   : > { %1308 = vmatprep.subr.bf16.mxu0 %v2283_v43 }
  0xde   : > { %1309 = vmatpush1.bf16.msra.mxu0 %v2281_v46 }
  0xdf   : > { %1310 = vmatprep.subr.bf16.mxu0 %v2289_v47 }
  0xe2   : > { %1311 = vmatpush1.bf16.msra.mxu0 %v2287_v49 }
  0xe3   : > { %1312 = vmatprep.subr.bf16.mxu0 %v2295_v50 }
  0xe6   : > { %1313 = vmatpush1.bf16.msra.mxu0 %v2293_v51 }
  0xe7   : > { %1323 = vmatprep.subr.bf16.mxu0 %v2301_v53 }
  0xe9   : > { %1315 = vmatmul.mubr.bf16.vlgmr.msra.gmra.mrb[0].mxu0 %v445_v55 }
  0xea   : > { %1324 = vmatpush1.bf16.msra.mxu0 %v2299_v56  ;;  %2007 = vmatprep.mubr.msk.bf16.mxu0 %vm1187_vm0, %v448_v57  ;;  %v2387_v56 = vld [vmem:[%s2846_s5 + $0x8] sm:$0xff]   ;;  %v2388_v57 = vld [vmem:[%s2846_s5 + $0x10] sm:$0xff]  }
  0xeb   : > { %1325 = vmatprep.subr.bf16.mxu0 %v2307_v58  ;;  %v2389_v58 = vld [vmem:[%s2846_s5 + $0x18] sm:$0xff]  }
  0xee   : > { %1326 = vmatpush1.bf16.msra.mxu0 %v2305_v59  ;;  %v2390_v59 = vld [vmem:[%s2846_s5 + $0x20] sm:$0xff]  }
  0xef   : > { %1327 = vmatprep.subr.bf16.mxu0 %v2313_v60  ;;  %v2391_v60 = vld [vmem:[%s2846_s5 + $0x28] sm:$0xff]  }
  0xf2   : > { %1328 = vmatpush1.bf16.msra.mxu0 %v2311_v61  ;;  %v2392_v61 = vld [vmem:[%s2846_s5 + $0x30] sm:$0xff]  }
  0xf3   : > { %1329 = vmatprep.subr.bf16.mxu0 %v2319_v62  ;;  %v2393_v62 = vld [vmem:[%s2846_s5 + $0x38] sm:$0xff]  }
  0xf6   : > { %1330 = vmatpush1.bf16.msra.mxu0 %v2317_v63 }
  0xf7   : > { %1331 = vmatprep.subr.bf16.mxu0 %v2325_v0  ;;  %v2008_v0 = vld [vmem:[%s2845_s4] ss:$0 sm:$0xff] }
  0xfa   : > { %1332 = vmatpush1.bf16.msra.mxu0 %v2323_v1 }
  0xfb   : > { %1333 = vmatprep.subr.bf16.mxu0 %v2331_v2 }
  0xfe   : > { %1334 = vmatpush1.bf16.msra.mxu0 %v2329_v3 }
  0xff   : > { %1335 = vmatprep.subr.bf16.mxu0 %v2337_v4 }
 0x102   : > { %1336 = vmatpush1.bf16.msra.mxu0 %v2335_v5 }
 0x103   : > { %1337 = vmatprep.subr.bf16.mxu0 %v2343_v6 }
 0x106   : > { %1338 = vmatpush1.bf16.msra.mxu0 %v2341_v7  ;;  %v2394_v7 = vld [vmem:[%s2848_s7] sm:$0xff]  }
 0x107   : > { %1339 = vmatprep.subr.bf16.mxu0 %v2349_v8 }
 0x10a   : > { %1340 = vmatpush1.bf16.msra.mxu0 %v2347_v9  ;;  %v2025_v9 = vld [vmem:[%s2847_s6] ss:$0 sm:$0xff] }
 0x10b   : > { %1341 = vmatprep.subr.bf16.mxu0 %v2355_v10 }
 0x10e   : > { %1342 = vmatpush1.bf16.msra.mxu0 %v2353_v11 }
 0x10f   : > { %1343 = vmatprep.subr.bf16.mxu0 %v2361_v12 }
 0x112   : > { %1344 = vmatpush1.bf16.msra.mxu0 %v2359_v14  ;;  %v1719_v14 = vld [vmem:[%s2850_s9] sm:$0xf] }
 0x113   : > { %1345 = vmatprep.subr.bf16.mxu0 %v2367_v15  ;;  %v1733_v18 = vsel %vm1731_vm3, %v1719_v14, 0 }
 0x116   : > { %1346 = vmatpush1.bf16.msra.mxu0 %v2365_v19  ;;  %v2034_v19 = vld [vmem:[%s2849_s8] ss:$0 sm:$0xff] }
 0x117   : > { %1347 = vmatprep.subr.bf16.mxu0 %v1198_v21 }
 0x11a   : > { %1348 = vmatpush1.bf16.msra.mxu0 %v1195_v22 }
 0x11d   : > { %1356 = vmatmul.mubr.bf16.vlgmr.msra.gmra.mrb[0].mxu0 %v447_v24 }
 0x185   : > { %v1234_v32 = vpop.f32.mrb[0].mxu1 }
 0x186   : > { %v1236_v33 = vpop.f32.mrb[1].mxu1  ;;  %v1235_v43 = vadd.f32 %v1234_v32, %v575_v41 }
 0x187   : > { %v1238_v34 = vpop.f32.mrb[2].mxu1  ;;  %v1237_v44 = vadd.f32 %v1236_v33, %v579_v42 }
 0x188   : > { %v1239_v35 = vpop.f32.mrb[3].mxu1 }
 0x1f0   : > { %v1357_v45 = vpop.f32.mrb[0].mxu0 }
 0x1f1   : > { %v2110_v46 = vadd.f32 %v1357_v45, %v1235_v43  ;;  %v1359_v47 = vpop.f32.mrb[1].mxu0 }
 0x1f2   : > { %v2112_v48 = vadd.f32 %v1359_v47, %v1237_v44  ;;  %v1361_v49 = vpop.f32.mrb[2].mxu0 }
 0x1f3   : > { %v1364_v50 = vmax.f32 %v2110_v46, 0.0  ;;  %v1362_v51 = vpop.f32.mrb[3].mxu0 }
 0x1f4   : > { %v1365_v52 = vmax.f32 %v2112_v48, 0.0 }
 0x1f5   : > { %v1366_v55 = vpack.c.bf16 %v1364_v50, %v1364_v50 }
 0x1f6   : > { %v1367_v53 = vpack.c.bf16 %v1365_v52, %v1365_v52 }
 0x1f8   : > { %1535 = vmatprep.mubr.bf16.mxu1 %v1367_v53 }
 0x1f9   : > { %1536 = vmatmul.mubr.bf16.vlgmr.msra.gmra.mrb[4].mxu1 %v1366_v55 }
 0x1fa   : > { %2078 = vmatpush3.bf16.msra.mxu1 %v2386_v54  ;;  %2093 = vmatprep.mubr.msk.bf16.mxu1 %vm2534_vm2, %v2533_v31 }
 0x1fb   : > { %2079 = vmatprep.subr.bf16.mxu1 %v2533_v31 }
 0x1fe   : > { %2080 = vmatpush3.bf16.msra.mxu1 %v2387_v56 }
 0x1ff   : > { %2081 = vmatprep.subr.bf16.mxu1 %v2533_v31 }
 0x202   : > { %2082 = vmatpush3.bf16.msra.mxu1 %v2388_v57 }
 0x203   : > { %2083 = vmatprep.subr.bf16.mxu1 %v2533_v31 }
 0x206   : > { %2084 = vmatpush3.bf16.msra.mxu1 %v2389_v58 }
 0x207   : > { %2085 = vmatprep.subr.bf16.mxu1 %v2533_v31 }
 0x20a   : > { %2086 = vmatpush3.bf16.msra.mxu1 %v2390_v59 }
 0x20b   : > { %2087 = vmatprep.subr.bf16.mxu1 %v2533_v31 }
 0x20e   : > { %2088 = vmatpush3.bf16.msra.mxu1 %v2391_v60 }
 0x20f   : > { %2089 = vmatprep.subr.bf16.mxu1 %v2533_v31 }
 0x212   : > { %2090 = vmatpush3.bf16.msra.mxu1 %v2392_v61 }
 0x213   : > { %2091 = vmatprep.subr.bf16.mxu1 %v2533_v31 }
 0x216   : > { %2092 = vmatpush3.bf16.msra.mxu1 %v2393_v62 }
 0x217   : > { %2097 = vmatprep.subr.bf16.mxu1 %v2533_v31 }
 0x2cc   : > { %v2058_v63 = vpop.f32.mrb[4].mxu1 }
 0x2cd   : > { %v2059_v1 = vpop.f32.mrb[5].mxu1 }
 0x2ce   : > { %v2060_v2 = vadd.f32 %v2059_v1, %v2058_v63  ;;  %v2061_v3 = vpop.f32.mrb[6].mxu1 }
 0x2cf   : > { %v2062_v4 = vpop.f32.mrb[7].mxu1 }
 0x2d0   : > { %v1538_v5 = vadd.f32 %v2060_v2, %v2008_v0 }
 0x2d2   : > { %v1543_v6 = vmax.f32 %v1538_v5, 0.0 }
 0x2d4   : > { %v1544_v8 = vpack.c.bf16 %v1543_v6, %v1543_v6 }
 0x2d6   : > { %2094 = vmatmul.mubr.bf16.vlgmr.msra.gmra.mrb[8].mxu1 %v1544_v8 }
 0x2d7   : > { %2098 = vmatpush3.bf16.msra.mxu1 %v2394_v7  ;;  %2099 = vmatprep.mubr.msk.bf16.mxu1 %vm2534_vm2, %v2533_v31 }
 0x2d8   : > { %2103 = vmatprep.subr.bf16.mxu1 %v2533_v31 }
 0x3a9   : > { %v1650_v10 = vpop.f32.mrb[8].mxu1 }
 0x3aa   : > { %v1651_v11 = vadd.f32 %v2025_v9, %v1650_v10  ;;  %v2095_v12 = vpop.f32.mrb[9].mxu1 }
 0x3ab   : > { %v1653_v13 = vpop.f32.mrb[10].mxu1 }
 0x3ac   : > { %v1656_v15 = vmax.f32 %v1651_v11, 0.0  ;;  %v2096_v16 = vpop.f32.mrb[11].mxu1 }
 0x3ae   : > { %v1657_v17 = vpack.c.bf16 %v1656_v15, %v1656_v15 }
 0x3b0   : > { %2100 = vmatmul.mubr.msk.bf16.vlgmr.msra.gmra.mrb[12].mxu1 %vm1673_vm4, %v1657_v17 }
 0x3b1   : > { %2104 = vmatpush3.bf16.msra.mxu1 %v1733_v18  ;;  %2105 = vmatprep.mubr.msk.bf16.mxu1 %vm2534_vm2, %v2533_v31 }
 0x483   : > { %v1711_v20 = vpop.f32.mrb[12].mxu1 }
 0x484   : > { %v1712_v21 = vadd.f32 %v2034_v19, %v1711_v20  ;;  %v2101_v22 = vpop.f32.mrb[13].mxu1 }
 0x485   : > { %v1714_v23 = vpop.f32.mrb[14].mxu1 }
 0x486   : > { %v1717_v24 = vmax.f32 %v1712_v21, 0.0  ;;  %v2102_v25 = vpop.f32.mrb[15].mxu1 }
 0x488   : > { %v1718_v26 = vpack.c.bf16 %v1717_v24, %v1717_v24 }
 0x48a   : > { %2106 = vmatmul.mubr.msk.bf16.vlgmr.msra.gmra.mrb[16].mxu1 %vm1727_vm5, %v1718_v26 }
 0x55d   : > { %v1769_v28 = vpop.f32.mrb[16].mxu1 }
 0x55e   : > { %v1770_v29 = vadd.f32 %v2037_v27, %v1769_v28  ;;  %v2107_v30 = vpop.f32.mrb[17].mxu1 }
 0x55f   : > { %v1772_v31 = vpop.f32.mrb[18].mxu1 }
 0x560   : > { %v2108_v32 = vpop.f32.mrb[19].mxu1  ;;  %v1776_v33 = vsel %vm1775_vm6, %v1770_v29, -inf }
 0x561   : > { %1777 = vmax.xlane.f32.xlu0 %v1776_v33 }
 0x5ee   : > { %v1778_v34 = vpop.xlane.xlu0 %1777 }
 0x5ef   : > { %v1779_v35 = vsub.f32 %v1770_v29, %v1778_v34 }
 0x5f1   : > { %v1780_v36 = vmul.f32 1.442695, %v1779_v35 }
 0x5f3   : > { %2395 = vpow2.f32 %v1780_v36 }
 0x5fd   : > { %v2396_v37 = vpop.eup %2395 }
 0x5fe   : > { %v1782_v38 = vsel %vm1775_vm6, %v2396_v37, 0.0 }
 0x5ff   : > { %1783 = vadd.xlane.f32.xlu0 %v1782_v38 }
 0x68c   : > { %v1784_v39 = vpop.xlane.xlu0 %1783 }
 0x68d   : > { %2397 = vrcp.f32 %v1784_v39 }
 0x697   : > { %v2398_v40 = vpop.eup %2397 }
 0x698   : > { %v1786_v41 = vmul.f32 %v2398_v40, %v2396_v37 }
 0x69a   : > { %1787 = vst.msk [vmem:[%s431_s24] sm:$0xff] %vm1775_vm6, %v1786_v41 }
 0x69b PF: > { %p22_p9 = scmp.ge.s32.totalorder %s2688_s30, 4   ;;  %s2866_s17 = smov %s2515_s18 }
 0x69c   : > { %s2867_s18 = smov %s2519_s19  ;;  %s2868_s19 = smov %s2697_s14 }
 0x69d   : > { %s2869_s20 = smov %s2688_s30  ;;  %24 = sbr.rel (!%p22_p9) target bundleno = 6 (0x6), region = 112 }
 0x6a4   :  { %1807 = vsyncpa [#allocation3], 1 }
 0x6a5   :  { %1809 = vsyncpa [#allocation3 + $0x1], 1 }
 0x6a6   :  { %1810 = vsyncpa [#allocation5], 1 }

</bundles_post_ra>
